<compile_context>
chip_gen: v7x
topology: tpu7x:2x2x1
jax: 0.10.0
libtpu: 0.0.40
codegen_flags: <defaults>
</compile_context>

<pallas_src>
import functools

import jax
import jax.numpy as jnp
import numpy as np
from jax.experimental import pallas as pl
from jax.experimental.pallas import tpu as pltpu


def _round_up(x, m):
    return ((x + m - 1) // m) * m


def _choose_tm(M, tile_m):
    """Pick an M tile (multiple of 128) minimizing padding; prefer >=2 steps."""
    cands = [t for t in (128, 256, 512, 1024) if t <= max(tile_m, 128)]
    best = None
    for tm in cands:
        Mp = _round_up(M, tm)
        steps = Mp // tm
        key = (steps < 2, Mp - M, -tm)
        if best is None or key < best[1]:
            best = ((tm, Mp), key)
    return best[0]


# --------------------------------------------------------------------------- #
# Pallas kernel: tiled  (patches @ W_scaled) + bias  [+ residual]  [ReLU]
#   patches, W are bf16 (MXU); bias-initialized f32 accumulation + epilogue.
# --------------------------------------------------------------------------- #
def _fused_matmul_bn_kernel(*refs, apply_relu, has_residual):
    if has_residual:
        p_ref, w_ref, b_ref, r_ref, o_ref, acc_ref = refs
    else:
        p_ref, w_ref, b_ref, o_ref, acc_ref = refs
        r_ref = None

    k = pl.program_id(2)

    @pl.when(k == 0)
    def _init():
        # Start the f32 accumulator at the per-channel BN bias (saves an
        # epilogue add).
        acc_ref[...] = jnp.broadcast_to(b_ref[...], acc_ref.shape)

    acc_ref[...] += jnp.dot(p_ref[...], w_ref[...],
                            preferred_element_type=jnp.float32)

    @pl.when(k == pl.num_programs(2) - 1)
    def _finalize():
        y = acc_ref[...]
        if has_residual:
            y = y + r_ref[...].astype(jnp.float32)   # fused shortcut add
        if apply_relu:
            y = jnp.maximum(y, 0.0)
        o_ref[...] = y.astype(o_ref.dtype)


def fused_matmul_bn(patches, w_scaled, bias, residual=None, apply_relu=True,
                    out_dtype=jnp.bfloat16, tile_m=1024,
                    vmem_budget=48 * 1024 * 1024):
    """relu?( patches @ w_scaled + bias (+ residual) ) as a Pallas matmul.

    patches:  (M, K)            -> cast to bf16
    w_scaled: (K, Cout)         BN scale already folded in -> cast to bf16
    bias:     (Cout,)           f32, used to seed the accumulator
    residual: (M, >=Cout) or None, streamed as bf16
    returns   (M, Cp) in out_dtype, Cp = output channels padded to 128 lanes
              (channel padding is kept so downstream kernels avoid re-padding).
    """
    M, K = patches.shape
    Cout = w_scaled.shape[1]

    # Lane-dense output channels; whole width resident when reasonable.
    Cp = _round_up(Cout, 128)
    tn = Cp if Cp <= 1024 else 512
    Cp = _round_up(Cp, tn)

    # K padded only to a 128 multiple; keep the whole weight VMEM-resident
    # (no K loop) whenever it fits, else tile K.
    Kp = _round_up(K, 128)
    if Kp * tn * 2 <= 12 * 1024 * 1024:
        tk = Kp
    else:
        tk = 1024
        Kp = _round_up(Kp, tk)

    tm, Mp = _choose_tm(M, tile_m)

    out_bytes = jnp.dtype(out_dtype).itemsize

    def _vmem_est(tm_):
        est = 2 * tm_ * tk * 2            # patch tiles (bf16, double buffered)
        est += 2 * tk * tn * 2            # weight tile(s) (bf16)
        est += 2 * tn * 4                 # bias
        est += tm_ * tn * 4               # f32 accumulator scratch
        est += 2 * tm_ * tn * out_bytes   # output tiles
        if residual is not None:
            est += 2 * tm_ * tn * 2       # bf16 residual tiles
        return est

    # Shrink tm until the working set fits the per-call VMEM budget
    # (budget chosen so the same config is safe on v7x's 64 MiB/TC).
    while tm > 128 and _vmem_est(tm) > vmem_budget:
        tm //= 2
        Mp = _round_up(M, tm)

    p = jnp.pad(patches.astype(jnp.bfloat16), ((0, Mp - M), (0, Kp - K)))
    w = jnp.pad(w_scaled.astype(jnp.bfloat16), ((0, Kp - K), (0, Cp - Cout)))
    b = jnp.pad(bias.reshape(1, -1).astype(jnp.float32),
                ((0, 0), (0, Cp - Cout)))

    grid = (Mp // tm, Cp // tn, Kp // tk)

    in_specs = [
        pl.BlockSpec((tm, tk), lambda i, j, k: (i, k)),   # patches tile
        # With Kp == tk and Cp == tn the block index is constant: the folded
        # weights stay resident in VMEM across the whole M sweep.
        pl.BlockSpec((tk, tn), lambda i, j, k: (k, j)),   # weight tile
        pl.BlockSpec((1, tn), lambda i, j, k: (0, j)),    # per-channel bias
    ]
    args = [p, w, b]
    if residual is not None:
        r = jnp.pad(residual.astype(jnp.bfloat16),
                    ((0, Mp - residual.shape[0]), (0, Cp - residual.shape[1])))
        in_specs.append(pl.BlockSpec((tm, tn), lambda i, j, k: (i, j)))
        args.append(r)

    kern = functools.partial(_fused_matmul_bn_kernel,
                             apply_relu=apply_relu,
                             has_residual=residual is not None)

    out = pl.pallas_call(
        kern,
        out_shape=jax.ShapeDtypeStruct((Mp, Cp), out_dtype),
        grid_spec=pltpu.PrefetchScalarGridSpec(
            num_scalar_prefetch=0,
            grid=grid,
            in_specs=in_specs,
            out_specs=pl.BlockSpec((tm, tn), lambda i, j, k: (i, j)),
            scratch_shapes=[pltpu.VMEM((tm, tn), jnp.float32)],
        ),
        compiler_params=pltpu.CompilerParams(
            dimension_semantics=("parallel", "parallel", "arbitrary"),
            # Explicit limit with headroom under v7x's 64 MiB/TC physical VMEM;
            # also fine on v5e/v6e (128 MiB).  The tm shrink loop above keeps
            # the working set below this.
            vmem_limit_bytes=vmem_budget,
        ),
    )(*args)

    # Strip row padding (rare: only when tm does not divide M); keep the
    # lane-dense channel padding for downstream kernels.
    return out if Mp == M else out[:M]


# --------------------------------------------------------------------------- #
# Plain-JAX glue
# --------------------------------------------------------------------------- #
def im2col_3x3(x_nhwc, stride):
    """Extract 3x3 patches (padding=1) -> (N*Ho*Wo, 9*C), preserving dtype."""
    N, H, W, C = x_nhwc.shape
    xp = jnp.pad(x_nhwc, ((0, 0), (1, 1), (1, 1), (0, 0)))
    Ho = (H + 2 - 3) // stride + 1
    Wo = (W + 2 - 3) // stride + 1
    cols = []
    for kh in range(3):
        for kw in range(3):
            cols.append(xp[:, kh:kh + (Ho - 1) * stride + 1:stride,
                              kw:kw + (Wo - 1) * stride + 1:stride, :])
    patches = jnp.stack(cols, axis=3)            # (N, Ho, Wo, 9, C)
    return patches.reshape(N * Ho * Wo, 9 * C), Ho, Wo


def bn_scale_bias(bn, eps=1e-5):
    gamma, beta, mean, var = bn
    scale = gamma / jnp.sqrt(var + eps)
    bias = beta - mean * scale
    return scale.astype(jnp.float32), bias.astype(jnp.float32)


def resblk_forward_nhwc(x_nhwc, params, stride, eps=1e-5):
    """resblk.forward, NHWC in/out (inference mode)."""
    N, H, W, Cin = x_nhwc.shape
    Cout = params["w1"].shape[-1]

    # Fold BN (eval-mode) into per-channel scale/bias; fold scale into weights.
    s1, b1 = bn_scale_bias(params["bn1"], eps)
    s2, b2 = bn_scale_bias(params["bn2"], eps)
    w1 = (params["w1"] * s1).reshape(9 * Cin, Cout)

    # Cast to bf16 BEFORE im2col so the 9x-expanded patch buffer is 2 B/elem.
    x_bf16 = x_nhwc.astype(jnp.bfloat16)

    # conv1(3x3, stride) + bn1 + ReLU    (Dropout = identity in eval mode)
    p1, Ho, Wo = im2col_3x3(x_bf16, stride)
    M = N * Ho * Wo
    out1 = fused_matmul_bn(p1, w1, b1, residual=None, apply_relu=True,
                           out_dtype=jnp.bfloat16)        # (M, Cp) bf16
    Cp = out1.shape[1]
    out1_nhwc = out1.reshape(N, Ho, Wo, Cp)

    # shortcut: 1x1 conv (stride) + bn when shapes change, else identity.
    # Kept in the padded (M, Cp) bf16 layout so it feeds conv2 directly.
    if stride != 1 or Cout != Cin:
        ssc, bsc = bn_scale_bias(params["bn_sc"], eps)
        wsc = (params["w_sc"] * ssc).reshape(Cin, Cout)
        xs = x_bf16[:, ::stride, ::stride, :].reshape(M, Cin)
        shortcut = fused_matmul_bn(xs, wsc, bsc, residual=None,
                                   apply_relu=False, out_dtype=jnp.bfloat16)
    else:
        shortcut = jnp.pad(x_bf16.reshape(M, Cin), ((0, 0), (0, Cp - Cout)))

    # conv2(3x3, stride=1) consumes the channel-padded out1: pad its input
    # channels with zeros so no slice+re-pad round trip is needed.
    w2_p = jnp.pad(params["w2"] * s2,
                   ((0, 0), (0, 0), (0, Cp - Cout), (0, 0))).reshape(9 * Cp, Cout)

    # conv2 + bn2 + residual add + ReLU, fused in one kernel call.
    p2, _, _ = im2col_3x3(out1_nhwc, 1)                    # (M, 9*Cp) bf16
    out2 = fused_matmul_bn(p2, w2_p, b2, residual=shortcut, apply_relu=True,
                           out_dtype=jnp.float32)          # (M, Cp) f32
    return out2[:, :Cout].reshape(N, Ho, Wo, Cout)


def resblk_forward(x_nchw, params, stride):
    """NCHW wrapper (PyTorch API parity)."""
    x = jnp.transpose(x_nchw, (0, 2, 3, 1))
    out = resblk_forward_nhwc(x, params, stride)
    return jnp.transpose(out, (0, 3, 1, 2))


# --------------------------------------------------------------------------- #
# Deterministic parameter init (shapes from resblk.__init__)
# --------------------------------------------------------------------------- #
def init_params(key, cin, cout):
    ks = jax.random.split(key, 15)

    def bn_init(k0, k1, k2, k3):
        g = 1.0 + 0.1 * jax.random.normal(k0, (cout,), jnp.float32)
        b = 0.1 * jax.random.normal(k1, (cout,), jnp.float32)
        m = 0.1 * jax.random.normal(k2, (cout,), jnp.float32)
        v = jnp.abs(jax.random.normal(k3, (cout,), jnp.float32)) + 0.5
        return (g, b, m, v)

    return {
        "w1":   0.1 * jax.random.normal(ks[0], (3, 3, cin, cout), jnp.float32),
        "w2":   0.1 * jax.random.normal(ks[1], (3, 3, cout, cout), jnp.float32),
        "w_sc": 0.1 * jax.random.normal(ks[2], (1, 1, cin, cout), jnp.float32),
        "bn1":   bn_init(ks[3], ks[4], ks[5], ks[6]),
        "bn2":   bn_init(ks[7], ks[8], ks[9], ks[10]),
        "bn_sc": bn_init(ks[11], ks[12], ks[13], ks[14]),
    }


# --------------------------------------------------------------------------- #
# Pure-JAX f32 reference (lax conv) for numerical check
# --------------------------------------------------------------------------- #
def ref_forward(x_nchw, params, stride, eps=1e-5):
    def conv(x, w_khkwio, s, pad):
        w = jnp.transpose(w_khkwio, (3, 2, 0, 1))          # OIHW
        return jax.lax.conv_general_dilated(
            x, w, (s, s), ((pad, pad), (pad, pad)),
            dimension_numbers=("NCHW", "OIHW", "NCHW"))

    def bn(x, p):
        g, b, m, v = p
        inv = g / jnp.sqrt(v + eps)
        return x * inv[None, :, None, None] + (b - m * inv)[None, :, None, None]

    out = jax.nn.relu(bn(conv(x_nchw, params["w1"], stride, 1), params["bn1"]))
    out = bn(conv(out, params["w2"], 1, 1), params["bn2"])
    sc = bn(conv(x_nchw, params["w_sc"], stride, 0), params["bn_sc"])
    return jax.nn.relu(out + sc)


# --------------------------------------------------------------------------- #
if __name__ == "__main__":
    key = jax.random.PRNGKey(0)
    kx, kp = jax.random.split(key)

    N, CIN, COUT, H, W, STRIDE = 2, 4, 8, 16, 16, 2
    x = jax.random.normal(kx, (N, CIN, H, W), jnp.float32)    # NCHW, like PyTorch
    params = init_params(kp, CIN, COUT)

    fwd = jax.jit(resblk_forward, static_argnums=2)
    out = jax.block_until_ready(fwd(x, params, STRIDE))

    ref = jax.block_until_ready(ref_forward(x, params, STRIDE))
    assert out.shape == (N, COUT, H // STRIDE, W // STRIDE), out.shape
    # bf16 MXU inputs / bf16 intermediates with f32 accumulation: compare
    # against the pure-f32 lax.conv reference with a bf16-level tolerance.
    np.testing.assert_allclose(np.asarray(out), np.asarray(ref),
                               rtol=5e-2, atol=5e-2)

    print("KERNEL_OK")
</pallas_src>

<mosaic_0001>
module attributes {stable_mosaic.version = 11 : i64} {
  func.func @_fused_matmul_bn_kernel(%arg0: i32, %arg1: i32, %arg2: i32, %arg3: memref<128x128xbf16, #tpu.memory_space<vmem>>, %arg4: memref<128x128xbf16, #tpu.memory_space<vmem>>, %arg5: memref<1x128xf32, #tpu.memory_space<vmem>>, %arg6: memref<128x128xbf16, #tpu.memory_space<vmem>>, %arg7: memref<128x128xf32, #tpu.memory_space<vmem>>) attributes {dimension_semantics = [#tpu.dimension_semantics<parallel>, #tpu.dimension_semantics<parallel>, #tpu.dimension_semantics<arbitrary>], iteration_bounds = array<i64: 1, 1, 1>, scalar_prefetch = 0 : i64, scratch_operands = 1 : i64, tpu.core_type = #tpu.core_type<tc>, window_params = [{transform_indices = @transform_0, window_bounds = array<i64: 128, 128>}, {transform_indices = @transform_1, window_bounds = array<i64: 128, 128>}, {transform_indices = @transform_2, window_bounds = array<i64: 1, 128>}, {transform_indices = @transform_3, window_bounds = array<i64: 128, 128>}]} {
    %c0_i32 = arith.constant 0 : i32
    %0 = arith.cmpi eq, %arg2, %c0_i32 : i32
    %1 = arith.extui %0 : i1 to i32
    %c0_i32_0 = arith.constant 0 : i32
    %2 = arith.cmpi ne, %1, %c0_i32_0 : i32
    scf.if %2 {
      %c0_10 = arith.constant 0 : index
      %c0_11 = arith.constant 0 : index
      %12 = vector.load %arg5[%c0_10, %c0_11] : memref<1x128xf32, #tpu.memory_space<vmem>>, vector<1x128xf32>
      %13 = vector.shape_cast %12 : vector<1x128xf32> to vector<1x128xf32>
      %14 = vector.broadcast %13 : vector<1x128xf32> to vector<128x128xf32>
      %c0_12 = arith.constant 0 : index
      %c0_13 = arith.constant 0 : index
      %15 = vector.load %arg7[%c0_12, %c0_13] : memref<128x128xf32, #tpu.memory_space<vmem>>, vector<128x128xf32>
      tpu.vector_store %arg7[%c0_12, %c0_13], %14 {strides = array<i32>} : memref<128x128xf32, #tpu.memory_space<vmem>>, vector<128x128xf32>,
    } else {
    }
    %c0 = arith.constant 0 : index
    %c0_1 = arith.constant 0 : index
    %3 = vector.load %arg7[%c0, %c0_1] : memref<128x128xf32, #tpu.memory_space<vmem>>, vector<128x128xf32>
    %c0_2 = arith.constant 0 : index
    %c0_3 = arith.constant 0 : index
    %4 = vector.load %arg3[%c0_2, %c0_3] : memref<128x128xbf16, #tpu.memory_space<vmem>>, vector<128x128xbf16>
    %c0_4 = arith.constant 0 : index
    %c0_5 = arith.constant 0 : index
    %5 = vector.load %arg4[%c0_4, %c0_5] : memref<128x128xbf16, #tpu.memory_space<vmem>>, vector<128x128xbf16>
    %cst = arith.constant dense<0.000000e+00> : vector<128x128xf32>
    %6 = tpu.matmul %4, %5, %cst {dimension_numbers = #tpu.dot_dimension_numbers<[1], [0], [0], [1], [0, 0, 1, 1], [], []>} : vector<128x128xbf16>, vector<128x128xbf16>, vector<128x128xf32> -> vector<128x128xf32>
    %7 = arith.addf %3, %6 : vector<128x128xf32>
    %c0_6 = arith.constant 0 : index
    %c0_7 = arith.constant 0 : index
    %8 = vector.load %arg7[%c0_6, %c0_7] : memref<128x128xf32, #tpu.memory_space<vmem>>, vector<128x128xf32>
    tpu.vector_store %arg7[%c0_6, %c0_7], %7 {strides = array<i32>} : memref<128x128xf32, #tpu.memory_space<vmem>>, vector<128x128xf32>,
    %c0_i32_8 = arith.constant 0 : i32
    %9 = arith.cmpi eq, %arg2, %c0_i32_8 : i32
    %10 = arith.extui %9 : i1 to i32
    %c0_i32_9 = arith.constant 0 : i32
    %11 = arith.cmpi ne, %10, %c0_i32_9 : i32
    scf.if %11 {
      %c0_10 = arith.constant 0 : index
      %c0_11 = arith.constant 0 : index
      %12 = vector.load %arg7[%c0_10, %c0_11] : memref<128x128xf32, #tpu.memory_space<vmem>>, vector<128x128xf32>
      %cst_12 = arith.constant 0.000000e+00 : f32
      %13 = vector.broadcast %cst_12 : f32 to vector<128x128xf32>
      %14 = arith.maximumf %12, %13 : vector<128x128xf32>
      %15 = arith.truncf %14 : vector<128x128xf32> to vector<128x128xbf16>
      %c0_13 = arith.constant 0 : index
      %c0_14 = arith.constant 0 : index
      %16 = vector.load %arg6[%c0_13, %c0_14] : memref<128x128xbf16, #tpu.memory_space<vmem>>, vector<128x128xbf16>
      tpu.vector_store %arg6[%c0_13, %c0_14], %15 {strides = array<i32>} : memref<128x128xbf16, #tpu.memory_space<vmem>>, vector<128x128xbf16>,
    } else {
    }
    return
  }
  func.func @transform_0(%arg0: i32, %arg1: i32, %arg2: i32) -> (i32, i32) {
    %c0_i32 = arith.constant 0 : i32
    return %arg0, %arg2 : i32, i32
  }
  func.func @transform_1(%arg0: i32, %arg1: i32, %arg2: i32) -> (i32, i32) {
    %c0_i32 = arith.constant 0 : i32
    return %arg2, %arg1 : i32, i32
  }
  func.func @transform_2(%arg0: i32, %arg1: i32, %arg2: i32) -> (i32, i32) {
    %c0_i32 = arith.constant 0 : i32
    %c0_i32_0 = arith.constant 0 : i32
    return %c0_i32, %arg1 : i32, i32
  }
  func.func @transform_3(%arg0: i32, %arg1: i32, %arg2: i32) -> (i32, i32) {
    %c0_i32 = arith.constant 0 : i32
    return %arg0, %arg1 : i32, i32
  }
}

module attributes {stable_mosaic.version = 11 : i64} {
  func.func @_fused_matmul_bn_kernel(%arg0: i32, %arg1: i32, %arg2: i32, %arg3: memref<128x128xbf16, #tpu.memory_space<vmem>>, %arg4: memref<128x128xbf16, #tpu.memory_space<vmem>>, %arg5: memref<1x128xf32, #tpu.memory_space<vmem>>, %arg6: memref<128x128xbf16, #tpu.memory_space<vmem>>, %arg7: memref<128x128xf32, #tpu.memory_space<vmem>>) attributes {dimension_semantics = [#tpu.dimension_semantics<parallel>, #tpu.dimension_semantics<parallel>, #tpu.dimension_semantics<arbitrary>], iteration_bounds = array<i64: 1, 1, 1>, scalar_prefetch = 0 : i64, scratch_operands = 1 : i64, tpu.core_type = #tpu.core_type<tc>, window_params = [{transform_indices = @transform_0, window_bounds = array<i64: 128, 128>}, {transform_indices = @transform_1, window_bounds = array<i64: 128, 128>}, {transform_indices = @transform_2, window_bounds = array<i64: 1, 128>}, {transform_indices = @transform_3, window_bounds = array<i64: 128, 128>}]} {
    %c0_i32 = arith.constant 0 : i32
    %0 = arith.cmpi eq, %arg2, %c0_i32 : i32
    %1 = arith.extui %0 : i1 to i32
    %c0_i32_0 = arith.constant 0 : i32
    %2 = arith.cmpi ne, %1, %c0_i32_0 : i32
    scf.if %2 {
      %c0_10 = arith.constant 0 : index
      %c0_11 = arith.constant 0 : index
      %12 = vector.load %arg5[%c0_10, %c0_11] : memref<1x128xf32, #tpu.memory_space<vmem>>, vector<1x128xf32>
      %13 = vector.shape_cast %12 : vector<1x128xf32> to vector<1x128xf32>
      %14 = vector.broadcast %13 : vector<1x128xf32> to vector<128x128xf32>
      %c0_12 = arith.constant 0 : index
      %c0_13 = arith.constant 0 : index
      %15 = vector.load %arg7[%c0_12, %c0_13] : memref<128x128xf32, #tpu.memory_space<vmem>>, vector<128x128xf32>
      tpu.vector_store %arg7[%c0_12, %c0_13], %14 {strides = array<i32>} : memref<128x128xf32, #tpu.memory_space<vmem>>, vector<128x128xf32>,
    } else {
    }
    %c0 = arith.constant 0 : index
    %c0_1 = arith.constant 0 : index
    %3 = vector.load %arg7[%c0, %c0_1] : memref<128x128xf32, #tpu.memory_space<vmem>>, vector<128x128xf32>
    %c0_2 = arith.constant 0 : index
    %c0_3 = arith.constant 0 : index
    %4 = vector.load %arg3[%c0_2, %c0_3] : memref<128x128xbf16, #tpu.memory_space<vmem>>, vector<128x128xbf16>
    %c0_4 = arith.constant 0 : index
    %c0_5 = arith.constant 0 : index
    %5 = vector.load %arg4[%c0_4, %c0_5] : memref<128x128xbf16, #tpu.memory_space<vmem>>, vector<128x128xbf16>
    %cst = arith.constant dense<0.000000e+00> : vector<128x128xf32>
    %6 = tpu.matmul %4, %5, %cst {dimension_numbers = #tpu.dot_dimension_numbers<[1], [0], [0], [1], [0, 0, 1, 1], [], []>} : vector<128x128xbf16>, vector<128x128xbf16>, vector<128x128xf32> -> vector<128x128xf32>
    %7 = arith.addf %3, %6 : vector<128x128xf32>
    %c0_6 = arith.constant 0 : index
    %c0_7 = arith.constant 0 : index
    %8 = vector.load %arg7[%c0_6, %c0_7] : memref<128x128xf32, #tpu.memory_space<vmem>>, vector<128x128xf32>
    tpu.vector_store %arg7[%c0_6, %c0_7], %7 {strides = array<i32>} : memref<128x128xf32, #tpu.memory_space<vmem>>, vector<128x128xf32>,
    %c0_i32_8 = arith.constant 0 : i32
    %9 = arith.cmpi eq, %arg2, %c0_i32_8 : i32
    %10 = arith.extui %9 : i1 to i32
    %c0_i32_9 = arith.constant 0 : i32
    %11 = arith.cmpi ne, %10, %c0_i32_9 : i32
    scf.if %11 {
      %c0_10 = arith.constant 0 : index
      %c0_11 = arith.constant 0 : index
      %12 = vector.load %arg7[%c0_10, %c0_11] : memref<128x128xf32, #tpu.memory_space<vmem>>, vector<128x128xf32>
      %13 = arith.truncf %12 : vector<128x128xf32> to vector<128x128xbf16>
      %c0_12 = arith.constant 0 : index
      %c0_13 = arith.constant 0 : index
      %14 = vector.load %arg6[%c0_12, %c0_13] : memref<128x128xbf16, #tpu.memory_space<vmem>>, vector<128x128xbf16>
      tpu.vector_store %arg6[%c0_12, %c0_13], %13 {strides = array<i32>} : memref<128x128xbf16, #tpu.memory_space<vmem>>, vector<128x128xbf16>,
    } else {
    }
    return
  }
  func.func @transform_0(%arg0: i32, %arg1: i32, %arg2: i32) -> (i32, i32) {
    %c0_i32 = arith.constant 0 : i32
    return %arg0, %arg2 : i32, i32
  }
  func.func @transform_1(%arg0: i32, %arg1: i32, %arg2: i32) -> (i32, i32) {
    %c0_i32 = arith.constant 0 : i32
    return %arg2, %arg1 : i32, i32
  }
  func.func @transform_2(%arg0: i32, %arg1: i32, %arg2: i32) -> (i32, i32) {
    %c0_i32 = arith.constant 0 : i32
    %c0_i32_0 = arith.constant 0 : i32
    return %c0_i32, %arg1 : i32, i32
  }
  func.func @transform_3(%arg0: i32, %arg1: i32, %arg2: i32) -> (i32, i32) {
    %c0_i32 = arith.constant 0 : i32
    return %arg0, %arg1 : i32, i32
  }
}

module attributes {stable_mosaic.version = 11 : i64} {
  func.func @_fused_matmul_bn_kernel(%arg0: i32, %arg1: i32, %arg2: i32, %arg3: memref<128x1152xbf16, #tpu.memory_space<vmem>>, %arg4: memref<1152x128xbf16, #tpu.memory_space<vmem>>, %arg5: memref<1x128xf32, #tpu.memory_space<vmem>>, %arg6: memref<128x128xbf16, #tpu.memory_space<vmem>>, %arg7: memref<128x128xf32, #tpu.memory_space<vmem>>, %arg8: memref<128x128xf32, #tpu.memory_space<vmem>>) attributes {dimension_semantics = [#tpu.dimension_semantics<parallel>, #tpu.dimension_semantics<parallel>, #tpu.dimension_semantics<arbitrary>], iteration_bounds = array<i64: 1, 1, 1>, scalar_prefetch = 0 : i64, scratch_operands = 1 : i64, tpu.core_type = #tpu.core_type<tc>, window_params = [{transform_indices = @transform_0, window_bounds = array<i64: 128, 1152>}, {transform_indices = @transform_1, window_bounds = array<i64: 1152, 128>}, {transform_indices = @transform_2, window_bounds = array<i64: 1, 128>}, {transform_indices = @transform_3, window_bounds = array<i64: 128, 128>}, {transform_indices = @transform_4, window_bounds = array<i64: 128, 128>}]} {
    %c0_i32 = arith.constant 0 : i32
    %0 = arith.cmpi eq, %arg2, %c0_i32 : i32
    %1 = arith.extui %0 : i1 to i32
    %c0_i32_0 = arith.constant 0 : i32
    %2 = arith.cmpi ne, %1, %c0_i32_0 : i32
    scf.if %2 {
      %c0_10 = arith.constant 0 : index
      %c0_11 = arith.constant 0 : index
      %12 = vector.load %arg5[%c0_10, %c0_11] : memref<1x128xf32, #tpu.memory_space<vmem>>, vector<1x128xf32>
      %13 = vector.shape_cast %12 : vector<1x128xf32> to vector<1x128xf32>
      %14 = vector.broadcast %13 : vector<1x128xf32> to vector<128x128xf32>
      %c0_12 = arith.constant 0 : index
      %c0_13 = arith.constant 0 : index
      %15 = vector.load %arg8[%c0_12, %c0_13] : memref<128x128xf32, #tpu.memory_space<vmem>>, vector<128x128xf32>
      tpu.vector_store %arg8[%c0_12, %c0_13], %14 {strides = array<i32>} : memref<128x128xf32, #tpu.memory_space<vmem>>, vector<128x128xf32>,
    } else {
    }
    %c0 = arith.constant 0 : index
    %c0_1 = arith.constant 0 : index
    %3 = vector.load %arg8[%c0, %c0_1] : memref<128x128xf32, #tpu.memory_space<vmem>>, vector<128x128xf32>
    %c0_2 = arith.constant 0 : index
    %c0_3 = arith.constant 0 : index
    %4 = vector.load %arg3[%c0_2, %c0_3] : memref<128x1152xbf16, #tpu.memory_space<vmem>>, vector<128x1152xbf16>
    %c0_4 = arith.constant 0 : index
    %c0_5 = arith.constant 0 : index
    %5 = vector.load %arg4[%c0_4, %c0_5] : memref<1152x128xbf16, #tpu.memory_space<vmem>>, vector<1152x128xbf16>
    %cst = arith.constant dense<0.000000e+00> : vector<128x128xf32>
    %6 = tpu.matmul %4, %5, %cst {dimension_numbers = #tpu.dot_dimension_numbers<[1], [0], [0], [1], [0, 0, 1, 1], [], []>} : vector<128x1152xbf16>, vector<1152x128xbf16>, vector<128x128xf32> -> vector<128x128xf32>
    %7 = arith.addf %3, %6 : vector<128x128xf32>
    %c0_6 = arith.constant 0 : index
    %c0_7 = arith.constant 0 : index
    %8 = vector.load %arg8[%c0_6, %c0_7] : memref<128x128xf32, #tpu.memory_space<vmem>>, vector<128x128xf32>
    tpu.vector_store %arg8[%c0_6, %c0_7], %7 {strides = array<i32>} : memref<128x128xf32, #tpu.memory_space<vmem>>, vector<128x128xf32>,
    %c0_i32_8 = arith.constant 0 : i32
    %9 = arith.cmpi eq, %arg2, %c0_i32_8 : i32
    %10 = arith.extui %9 : i1 to i32
    %c0_i32_9 = arith.constant 0 : i32
    %11 = arith.cmpi ne, %10, %c0_i32_9 : i32
    scf.if %11 {
      %c0_10 = arith.constant 0 : index
      %c0_11 = arith.constant 0 : index
      %12 = vector.load %arg8[%c0_10, %c0_11] : memref<128x128xf32, #tpu.memory_space<vmem>>, vector<128x128xf32>
      %c0_12 = arith.constant 0 : index
      %c0_13 = arith.constant 0 : index
      %13 = vector.load %arg6[%c0_12, %c0_13] : memref<128x128xbf16, #tpu.memory_space<vmem>>, vector<128x128xbf16>
      %14 = arith.extf %13 : vector<128x128xbf16> to vector<128x128xf32>
      %15 = arith.addf %12, %14 : vector<128x128xf32>
      %cst_14 = arith.constant 0.000000e+00 : f32
      %16 = vector.broadcast %cst_14 : f32 to vector<128x128xf32>
      %17 = arith.maximumf %15, %16 : vector<128x128xf32>
      %c0_15 = arith.constant 0 : index
      %c0_16 = arith.constant 0 : index
      %18 = vector.load %arg7[%c0_15, %c0_16] : memref<128x128xf32, #tpu.memory_space<vmem>>, vector<128x128xf32>
      tpu.vector_store %arg7[%c0_15, %c0_16], %17 {strides = array<i32>} : memref<128x128xf32, #tpu.memory_space<vmem>>, vector<128x128xf32>,
    } else {
    }
    return
  }
  func.func @transform_0(%arg0: i32, %arg1: i32, %arg2: i32) -> (i32, i32) {
    %c0_i32 = arith.constant 0 : i32
    return %arg0, %arg2 : i32, i32
  }
  func.func @transform_1(%arg0: i32, %arg1: i32, %arg2: i32) -> (i32, i32) {
    %c0_i32 = arith.constant 0 : i32
    return %arg2, %arg1 : i32, i32
  }
  func.func @transform_2(%arg0: i32, %arg1: i32, %arg2: i32) -> (i32, i32) {
    %c0_i32 = arith.constant 0 : i32
    %c0_i32_0 = arith.constant 0 : i32
    return %c0_i32, %arg1 : i32, i32
  }
  func.func @transform_3(%arg0: i32, %arg1: i32, %arg2: i32) -> (i32, i32) {
    %c0_i32 = arith.constant 0 : i32
    return %arg0, %arg1 : i32, i32
  }
  func.func @transform_4(%arg0: i32, %arg1: i32, %arg2: i32) -> (i32, i32) {
    %c0_i32 = arith.constant 0 : i32
    return %arg0, %arg1 : i32, i32
  }
}

</mosaic_0001>

<bundles_post_ra>
// kernel: resblk_forward.3
= control target key start
LH: loop header
LB: loop body
LE: loop exit
PB: predicated region body
PF: predicated region fallthrough
CT: control target
= control target key end

     0   :  { %s705_s1 = inlined_call_operand.vmem [shape: bf16[128,128], index: 1, kind: input, shape index: {}]   ;;  %s706_s0 = inlined_call_operand.vmem [shape: bf16[128,128], index: 0, kind: input, shape index: {}]   ;;  %s707_s2 = inlined_call_operand.vmem [shape: f32[1,128], index: 2, kind: input, shape index: {}]   ;;  %s708_s3 = inlined_call_operand.vmem [shape: bf16[128,128], index: 3, kind: output, shape index: {}]  }
   0x1   :  { %v594_v0 = vld [vmem:[%s705_s1] sm:$0xff]   ;;  %v595_v1 = vld [vmem:[%s705_s1 + $0x8] sm:$0xff]   ;;  %v596_v2 = vld [vmem:[%s705_s1 + $0x10] sm:$0xff]  }
   0x2   :  { %546 = vmatprep.subr.bf16.mxu0 %v594_v0  ;;  %578 = vmatprep.subr.bf16.mxu1 %v594_v0  ;;  %v597_v3 = vld [vmem:[%s705_s1 + $0x18] sm:$0xff]   ;;  %v602_v4 = vld [vmem:[%s706_s0] sm:$0xff]   ;;  %v599_v7 = vld [vmem:[%s705_s1 + $0x28] sm:$0xff]  }
   0x3   :  { %547 = vmatpush3.bf16.msra.mxu0 %v594_v0  ;;  %586 = vmatpush3.bf16.msra.mxu1 %v594_v0  ;;  %v603_v5 = vld [vmem:[%s706_s0 + $0x20] sm:$0xff]   ;;  %v600_v8 = vld [vmem:[%s705_s1 + $0x30] sm:$0xff]   ;;  %v601_v9 = vld [vmem:[%s705_s1 + $0x38] sm:$0xff]  }
   0x4   :  { %548 = vmatprep.subr.bf16.mxu0 %v595_v1  ;;  %579 = vmatprep.subr.bf16.mxu1 %v595_v1  ;;  %v598_v6 = vld [vmem:[%s705_s1 + $0x20] sm:$0xff]   ;;  %v604_v10 = vld [vmem:[%s706_s0 + $0x8] sm:$0xff]   ;;  %v606_v12 = vld [vmem:[%s706_s0 + $0x10] sm:$0xff]  }
   0x5   :  { %562 = vmatprep.mubr.bf16.mxu0 %v602_v4  ;;  %570 = vmatprep.mubr.bf16.mxu1 %v603_v5  ;;  %v605_v11 = vld [vmem:[%s706_s0 + $0x28] sm:$0xff]   ;;  %v607_v13 = vld [vmem:[%s706_s0 + $0x30] sm:$0xff]   ;;  %v608_v14 = vld [vmem:[%s706_s0 + $0x18] sm:$0xff]  }
   0x6   :  { %v609_v15 = vld [vmem:[%s706_s0 + $0x38] sm:$0xff]   ;;  %v434_v16 = vld [vmem:[%s707_s2] ss:$0 sm:$0xff] }
   0x7   :  { %549 = vmatpush3.bf16.msra.mxu0 %v595_v1  ;;  %587 = vmatpush3.bf16.msra.mxu1 %v595_v1 }
   0x8   :  { %550 = vmatprep.subr.bf16.mxu0 %v596_v2  ;;  %580 = vmatprep.subr.bf16.mxu1 %v596_v2 }
   0xb   :  { %551 = vmatpush3.bf16.msra.mxu0 %v596_v2  ;;  %588 = vmatpush3.bf16.msra.mxu1 %v596_v2 }
   0xc   :  { %552 = vmatprep.subr.bf16.mxu0 %v597_v3  ;;  %581 = vmatprep.subr.bf16.mxu1 %v597_v3 }
   0xf   :  { %553 = vmatpush3.bf16.msra.mxu0 %v597_v3  ;;  %589 = vmatpush3.bf16.msra.mxu1 %v597_v3 }
  0x10   :  { %554 = vmatprep.subr.bf16.mxu0 %v598_v6  ;;  %582 = vmatprep.subr.bf16.mxu1 %v598_v6 }
  0x13   :  { %555 = vmatpush3.bf16.msra.mxu0 %v598_v6  ;;  %590 = vmatpush3.bf16.msra.mxu1 %v598_v6 }
  0x14   :  { %556 = vmatprep.subr.bf16.mxu0 %v599_v7  ;;  %583 = vmatprep.subr.bf16.mxu1 %v599_v7 }
  0x17   :  { %557 = vmatpush3.bf16.msra.mxu0 %v599_v7  ;;  %591 = vmatpush3.bf16.msra.mxu1 %v599_v7 }
  0x18   :  { %558 = vmatprep.subr.bf16.mxu0 %v600_v8  ;;  %584 = vmatprep.subr.bf16.mxu1 %v600_v8 }
  0x1b   :  { %559 = vmatpush3.bf16.msra.mxu0 %v600_v8  ;;  %592 = vmatpush3.bf16.msra.mxu1 %v600_v8 }
  0x1c   :  { %560 = vmatprep.subr.bf16.mxu0 %v601_v9  ;;  %585 = vmatprep.subr.bf16.mxu1 %v601_v9 }
  0x1f   :  { %561 = vmatpush3.bf16.msra.mxu0 %v601_v9  ;;  %593 = vmatpush3.bf16.msra.mxu1 %v601_v9 }
  0x22   :  { %563 = vmatmul.mubr.bf16.vlgmr.msra.gmra.mrb[0].mxu0 %v604_v10  ;;  %571 = vmatmul.mubr.bf16.vlgmr.msra.gmra.mrb[0].mxu1 %v605_v11 }
  0x23   :  { %566 = vmatprep.mubr.bf16.mxu0 %v606_v12  ;;  %574 = vmatprep.mubr.bf16.mxu1 %v607_v13 }
  0x2a   :  { %567 = vmatmul.mubr.bf16.gmra.mrb[4].mxu0 %v608_v14  ;;  %575 = vmatmul.mubr.bf16.gmra.mrb[4].mxu1 %v609_v15 }
  0xf5   :  { %v564_v17 = vpop.f32.mrb[0].mxu0  ;;  %v572_v18 = vpop.f32.mrb[0].mxu1 }
  0xf6   :  { %v285_v19 = vadd.f32 %v564_v17, %v434_v16  ;;  %v293_v20 = vadd.f32 %v572_v18, %v434_v16  ;;  %v220_v21 = vpop.f32.mrb[1].mxu0  ;;  %v252_v22 = vpop.f32.mrb[1].mxu1 }
  0xf7   :  { %v283_v23 = vadd.f32 %v434_v16, %v220_v21  ;;  %v291_v24 = vadd.f32 %v434_v16, %v252_v22  ;;  %v565_v25 = vpop.f32.mrb[2].mxu0  ;;  %v573_v26 = vpop.f32.mrb[2].mxu1 }
  0xf8   :  { %v286_v27 = vadd.f32 %v565_v25, %v434_v16  ;;  %v294_v28 = vadd.f32 %v573_v26, %v434_v16  ;;  %v223_v29 = vpop.f32.mrb[3].mxu0  ;;  %v255_v30 = vpop.f32.mrb[3].mxu1  ;;  %v336_v33 = vmax.f32 %v285_v19, 0.0  ;;  %v344_v34 = vmax.f32 %v293_v20, 0.0 }
  0xf9   :  { %v284_v31 = vadd.f32 %v434_v16, %v223_v29  ;;  %v292_v32 = vadd.f32 %v434_v16, %v255_v30  ;;  %v334_v37 = vmax.f32 %v283_v23, 0.0  ;;  %v342_v38 = vmax.f32 %v291_v24, 0.0 }
  0xfa   :  { %v337_v35 = vmax.f32 %v286_v27, 0.0  ;;  %v345_v36 = vmax.f32 %v294_v28, 0.0 }
  0xfb   :  { %v335_v39 = vmax.f32 %v284_v31, 0.0  ;;  %v343_v40 = vmax.f32 %v292_v32, 0.0 }
  0xfc   :  { %v491_v41 = vpack.c.bf16 %v337_v35, %v336_v33  ;;  %v511_v42 = vpack.c.bf16 %v345_v36, %v344_v34 }
  0xfd   :  { %v486_v43 = vpack.c.bf16 %v335_v39, %v334_v37  ;;  %v506_v44 = vpack.c.bf16 %v343_v40, %v342_v38  ;;  %v568_v45 = vpop.f32.mrb[4].mxu0  ;;  %v576_v46 = vpop.f32.mrb[4].mxu1 }
  0xfe   :  { %523 = vst [vmem:[%s708_s3 + $0x8] sm:$0xff] %v491_v41   ;;  %527 = vst [vmem:[%s708_s3 + $0x28] sm:$0xff] %v511_v42   ;;  %v289_v47 = vadd.f32 %v568_v45, %v434_v16  ;;  %v297_v48 = vadd.f32 %v576_v46, %v434_v16  ;;  %v236_v49 = vpop.f32.mrb[5].mxu0  ;;  %v268_v50 = vpop.f32.mrb[5].mxu1 }
  0xff   :  { %487 = vst [vmem:[%s708_s3] sm:$0xff] %v486_v43   ;;  %526 = vst [vmem:[%s708_s3 + $0x20] sm:$0xff] %v506_v44   ;;  %v287_v51 = vadd.f32 %v434_v16, %v236_v49  ;;  %v295_v52 = vadd.f32 %v434_v16, %v268_v50  ;;  %v569_v53 = vpop.f32.mrb[6].mxu0  ;;  %v577_v54 = vpop.f32.mrb[6].mxu1 }
 0x100   :  { %v290_v55 = vadd.f32 %v569_v53, %v434_v16  ;;  %v298_v56 = vadd.f32 %v577_v54, %v434_v16  ;;  %v239_v57 = vpop.f32.mrb[7].mxu0  ;;  %v271_v58 = vpop.f32.mrb[7].mxu1  ;;  %v340_v61 = vmax.f32 %v289_v47, 0.0  ;;  %v348_v62 = vmax.f32 %v297_v48, 0.0 }
 0x101   :  { %v288_v59 = vadd.f32 %v434_v16, %v239_v57  ;;  %v296_v60 = vadd.f32 %v434_v16, %v271_v58  ;;  %v338_v1 = vmax.f32 %v287_v51, 0.0  ;;  %v346_v2 = vmax.f32 %v295_v52, 0.0 }
 0x102   :  { %v341_v63 = vmax.f32 %v290_v55, 0.0  ;;  %v349_v0 = vmax.f32 %v298_v56, 0.0 }
 0x103   :  { %v339_v3 = vmax.f32 %v288_v59, 0.0  ;;  %v347_v4 = vmax.f32 %v296_v60, 0.0 }
 0x104   :  { %v501_v5 = vpack.c.bf16 %v341_v63, %v340_v61  ;;  %v521_v6 = vpack.c.bf16 %v349_v0, %v348_v62 }
 0x105   :  { %v496_v7 = vpack.c.bf16 %v339_v3, %v338_v1  ;;  %v516_v8 = vpack.c.bf16 %v347_v4, %v346_v2 }
 0x106   :  { %525 = vst [vmem:[%s708_s3 + $0x18] sm:$0xff] %v501_v5   ;;  %529 = vst [vmem:[%s708_s3 + $0x38] sm:$0xff] %v521_v6  }
 0x107   :  { %524 = vst [vmem:[%s708_s3 + $0x10] sm:$0xff] %v496_v7   ;;  %528 = vst [vmem:[%s708_s3 + $0x30] sm:$0xff] %v516_v8  }

// kernel: resblk_forward.4
= control target key start
LH: loop header
LB: loop body
LE: loop exit
PB: predicated region body
PF: predicated region fallthrough
CT: control target
= control target key end

     0   :  { %s689_s1 = inlined_call_operand.vmem [shape: bf16[128,128], index: 1, kind: input, shape index: {}]   ;;  %s690_s0 = inlined_call_operand.vmem [shape: bf16[128,128], index: 0, kind: input, shape index: {}]   ;;  %s691_s2 = inlined_call_operand.vmem [shape: f32[1,128], index: 2, kind: input, shape index: {}]   ;;  %s692_s3 = inlined_call_operand.vmem [shape: bf16[128,128], index: 3, kind: output, shape index: {}]  }
   0x1   :  { %v578_v0 = vld [vmem:[%s689_s1] sm:$0xff]   ;;  %v579_v1 = vld [vmem:[%s689_s1 + $0x8] sm:$0xff]   ;;  %v580_v2 = vld [vmem:[%s689_s1 + $0x10] sm:$0xff]  }
   0x2   :  { %530 = vmatprep.subr.bf16.mxu0 %v578_v0  ;;  %562 = vmatprep.subr.bf16.mxu1 %v578_v0  ;;  %v581_v3 = vld [vmem:[%s689_s1 + $0x18] sm:$0xff]   ;;  %v586_v4 = vld [vmem:[%s690_s0] sm:$0xff]   ;;  %v583_v7 = vld [vmem:[%s689_s1 + $0x28] sm:$0xff]  }
   0x3   :  { %531 = vmatpush3.bf16.msra.mxu0 %v578_v0  ;;  %570 = vmatpush3.bf16.msra.mxu1 %v578_v0  ;;  %v587_v5 = vld [vmem:[%s690_s0 + $0x20] sm:$0xff]   ;;  %v584_v8 = vld [vmem:[%s689_s1 + $0x30] sm:$0xff]   ;;  %v585_v9 = vld [vmem:[%s689_s1 + $0x38] sm:$0xff]  }
   0x4   :  { %532 = vmatprep.subr.bf16.mxu0 %v579_v1  ;;  %563 = vmatprep.subr.bf16.mxu1 %v579_v1  ;;  %v582_v6 = vld [vmem:[%s689_s1 + $0x20] sm:$0xff]   ;;  %v588_v10 = vld [vmem:[%s690_s0 + $0x8] sm:$0xff]   ;;  %v590_v12 = vld [vmem:[%s690_s0 + $0x10] sm:$0xff]  }
   0x5   :  { %546 = vmatprep.mubr.bf16.mxu0 %v586_v4  ;;  %554 = vmatprep.mubr.bf16.mxu1 %v587_v5  ;;  %v589_v11 = vld [vmem:[%s690_s0 + $0x28] sm:$0xff]   ;;  %v591_v13 = vld [vmem:[%s690_s0 + $0x30] sm:$0xff]   ;;  %v592_v14 = vld [vmem:[%s690_s0 + $0x18] sm:$0xff]  }
   0x6   :  { %v593_v15 = vld [vmem:[%s690_s0 + $0x38] sm:$0xff]   ;;  %v418_v16 = vld [vmem:[%s691_s2] ss:$0 sm:$0xff] }
   0x7   :  { %533 = vmatpush3.bf16.msra.mxu0 %v579_v1  ;;  %571 = vmatpush3.bf16.msra.mxu1 %v579_v1 }
   0x8   :  { %534 = vmatprep.subr.bf16.mxu0 %v580_v2  ;;  %564 = vmatprep.subr.bf16.mxu1 %v580_v2 }
   0xb   :  { %535 = vmatpush3.bf16.msra.mxu0 %v580_v2  ;;  %572 = vmatpush3.bf16.msra.mxu1 %v580_v2 }
   0xc   :  { %536 = vmatprep.subr.bf16.mxu0 %v581_v3  ;;  %565 = vmatprep.subr.bf16.mxu1 %v581_v3 }
   0xf   :  { %537 = vmatpush3.bf16.msra.mxu0 %v581_v3  ;;  %573 = vmatpush3.bf16.msra.mxu1 %v581_v3 }
  0x10   :  { %538 = vmatprep.subr.bf16.mxu0 %v582_v6  ;;  %566 = vmatprep.subr.bf16.mxu1 %v582_v6 }
  0x13   :  { %539 = vmatpush3.bf16.msra.mxu0 %v582_v6  ;;  %574 = vmatpush3.bf16.msra.mxu1 %v582_v6 }
  0x14   :  { %540 = vmatprep.subr.bf16.mxu0 %v583_v7  ;;  %567 = vmatprep.subr.bf16.mxu1 %v583_v7 }
  0x17   :  { %541 = vmatpush3.bf16.msra.mxu0 %v583_v7  ;;  %575 = vmatpush3.bf16.msra.mxu1 %v583_v7 }
  0x18   :  { %542 = vmatprep.subr.bf16.mxu0 %v584_v8  ;;  %568 = vmatprep.subr.bf16.mxu1 %v584_v8 }
  0x1b   :  { %543 = vmatpush3.bf16.msra.mxu0 %v584_v8  ;;  %576 = vmatpush3.bf16.msra.mxu1 %v584_v8 }
  0x1c   :  { %544 = vmatprep.subr.bf16.mxu0 %v585_v9  ;;  %569 = vmatprep.subr.bf16.mxu1 %v585_v9 }
  0x1f   :  { %545 = vmatpush3.bf16.msra.mxu0 %v585_v9  ;;  %577 = vmatpush3.bf16.msra.mxu1 %v585_v9 }
  0x22   :  { %547 = vmatmul.mubr.bf16.vlgmr.msra.gmra.mrb[0].mxu0 %v588_v10  ;;  %555 = vmatmul.mubr.bf16.vlgmr.msra.gmra.mrb[0].mxu1 %v589_v11 }
  0x23   :  { %550 = vmatprep.mubr.bf16.mxu0 %v590_v12  ;;  %558 = vmatprep.mubr.bf16.mxu1 %v591_v13 }
  0x2a   :  { %551 = vmatmul.mubr.bf16.gmra.mrb[4].mxu0 %v592_v14  ;;  %559 = vmatmul.mubr.bf16.gmra.mrb[4].mxu1 %v593_v15 }
  0xf5   :  { %v548_v17 = vpop.f32.mrb[0].mxu0  ;;  %v556_v18 = vpop.f32.mrb[0].mxu1 }
  0xf6   :  { %v220_v19 = vpop.f32.mrb[1].mxu0  ;;  %v252_v20 = vpop.f32.mrb[1].mxu1  ;;  %v285_v23 = vadd.f32 %v548_v17, %v418_v16  ;;  %v293_v24 = vadd.f32 %v556_v18, %v418_v16 }
  0xf7   :  { %v549_v21 = vpop.f32.mrb[2].mxu0  ;;  %v557_v22 = vpop.f32.mrb[2].mxu1  ;;  %v283_v29 = vadd.f32 %v418_v16, %v220_v19  ;;  %v291_v30 = vadd.f32 %v418_v16, %v252_v20 }
  0xf8   :  { %v286_v25 = vadd.f32 %v549_v21, %v418_v16  ;;  %v294_v26 = vadd.f32 %v557_v22, %v418_v16  ;;  %v223_v27 = vpop.f32.mrb[3].mxu0  ;;  %v255_v28 = vpop.f32.mrb[3].mxu1 }
  0xf9   :  { %v284_v31 = vadd.f32 %v418_v16, %v223_v27  ;;  %v292_v32 = vadd.f32 %v418_v16, %v255_v28 }
  0xfa   :  { %v475_v33 = vpack.c.bf16 %v286_v25, %v285_v23  ;;  %v495_v34 = vpack.c.bf16 %v294_v26, %v293_v24 }
  0xfb   :  { %v470_v35 = vpack.c.bf16 %v284_v31, %v283_v29  ;;  %v490_v36 = vpack.c.bf16 %v292_v32, %v291_v30 }
  0xfc   :  { %507 = vst [vmem:[%s692_s3 + $0x8] sm:$0xff] %v475_v33   ;;  %511 = vst [vmem:[%s692_s3 + $0x28] sm:$0xff] %v495_v34  }
  0xfd   :  { %471 = vst [vmem:[%s692_s3] sm:$0xff] %v470_v35   ;;  %510 = vst [vmem:[%s692_s3 + $0x20] sm:$0xff] %v490_v36   ;;  %v552_v37 = vpop.f32.mrb[4].mxu0  ;;  %v560_v38 = vpop.f32.mrb[4].mxu1 }
  0xfe   :  { %v236_v39 = vpop.f32.mrb[5].mxu0  ;;  %v268_v40 = vpop.f32.mrb[5].mxu1  ;;  %v289_v43 = vadd.f32 %v552_v37, %v418_v16  ;;  %v297_v44 = vadd.f32 %v560_v38, %v418_v16 }
  0xff   :  { %v553_v41 = vpop.f32.mrb[6].mxu0  ;;  %v561_v42 = vpop.f32.mrb[6].mxu1  ;;  %v287_v49 = vadd.f32 %v418_v16, %v236_v39  ;;  %v295_v50 = vadd.f32 %v418_v16, %v268_v40 }
 0x100   :  { %v290_v45 = vadd.f32 %v553_v41, %v418_v16  ;;  %v298_v46 = vadd.f32 %v561_v42, %v418_v16  ;;  %v239_v47 = vpop.f32.mrb[7].mxu0  ;;  %v271_v48 = vpop.f32.mrb[7].mxu1 }
 0x101   :  { %v288_v51 = vadd.f32 %v418_v16, %v239_v47  ;;  %v296_v52 = vadd.f32 %v418_v16, %v271_v48 }
 0x102   :  { %v485_v53 = vpack.c.bf16 %v290_v45, %v289_v43  ;;  %v505_v54 = vpack.c.bf16 %v298_v46, %v297_v44 }
 0x103   :  { %v480_v55 = vpack.c.bf16 %v288_v51, %v287_v49  ;;  %v500_v56 = vpack.c.bf16 %v296_v52, %v295_v50 }
 0x104   :  { %509 = vst [vmem:[%s692_s3 + $0x18] sm:$0xff] %v485_v53   ;;  %513 = vst [vmem:[%s692_s3 + $0x38] sm:$0xff] %v505_v54  }
 0x105   :  { %508 = vst [vmem:[%s692_s3 + $0x10] sm:$0xff] %v480_v55   ;;  %512 = vst [vmem:[%s692_s3 + $0x30] sm:$0xff] %v500_v56  }

// kernel: resblk_forward.5
= control target key start
LH: loop header
LB: loop body
LE: loop exit
PB: predicated region body
PF: predicated region fallthrough
CT: control target
= control target key end

     0   :  { %s3076_s1 = inlined_call_operand.vmem [shape: bf16[1152,128], index: 1, kind: input, shape index: {}]   ;;  %s3077_s0 = inlined_call_operand.vmem [shape: bf16[128,1152], index: 0, kind: input, shape index: {}]   ;;  %s3078_s3 = inlined_call_operand.vmem [shape: bf16[128,128], index: 3, kind: input, shape index: {}]   ;;  %s3079_s2 = inlined_call_operand.vmem [shape: f32[1,128], index: 2, kind: input, shape index: {}]   ;;  %s3080_s4 = inlined_call_operand.vmem [shape: f32[128,128], index: 4, kind: output, shape index: {}]  }
   0x1   :  { %v2209_v0 = vld [vmem:[%s3076_s1 + $0x40] sm:$0xff]   ;;  %v2213_v4 = vld [vmem:[%s3076_s1 + $0x48] sm:$0xff]   ;;  %v2217_v8 = vld [vmem:[%s3076_s1 + $0x50] sm:$0xff]  }
   0x2   :  { %v2210_v1 = vld [vmem:[%s3076_s1 + $0xc0] sm:$0xff]   ;;  %1889 = vmatprep.subr.bf16.mxu0 %v2209_v0  ;;  %v2214_v5 = vld [vmem:[%s3076_s1 + $0xc8] sm:$0xff]   ;;  %v2218_v9 = vld [vmem:[%s3076_s1 + $0xd0] sm:$0xff]  }
   0x3   :  { %v2211_v2 = vld [vmem:[%s3076_s1] sm:$0xff]   ;;  %1953 = vmatprep.subr.bf16.mxu1 %v2210_v1  ;;  %v2215_v6 = vld [vmem:[%s3076_s1 + $0x8] sm:$0xff]   ;;  %v2219_v10 = vld [vmem:[%s3076_s1 + $0x10] sm:$0xff]  }
   0x4   :  { %v2212_v3 = vld [vmem:[%s3076_s1 + $0x80] sm:$0xff]   ;;  %1890 = vmatpush3.bf16.msra.mxu0 %v2211_v2  ;;  %v2216_v7 = vld [vmem:[%s3076_s1 + $0x88] sm:$0xff]   ;;  %v2220_v11 = vld [vmem:[%s3076_s1 + $0x90] sm:$0xff]  }
   0x5   :  { %1954 = vmatpush3.bf16.msra.mxu1 %v2212_v3  ;;  %1891 = vmatprep.subr.bf16.mxu0 %v2213_v4  ;;  %v2221_v12 = vld [vmem:[%s3076_s1 + $0x58] sm:$0xff]   ;;  %v2225_v16 = vld [vmem:[%s3076_s1 + $0x60] sm:$0xff]   ;;  %v2229_v20 = vld [vmem:[%s3076_s1 + $0x68] sm:$0xff]  }
   0x6   :  { %1955 = vmatprep.subr.bf16.mxu1 %v2214_v5  ;;  %v2222_v13 = vld [vmem:[%s3076_s1 + $0xd8] sm:$0xff]   ;;  %v2226_v17 = vld [vmem:[%s3076_s1 + $0xe0] sm:$0xff]   ;;  %v2230_v21 = vld [vmem:[%s3076_s1 + $0xe8] sm:$0xff]  }
   0x7   :  { %v2223_v14 = vld [vmem:[%s3076_s1 + $0x18] sm:$0xff]   ;;  %v2227_v18 = vld [vmem:[%s3076_s1 + $0x20] sm:$0xff]   ;;  %v2231_v22 = vld [vmem:[%s3076_s1 + $0x28] sm:$0xff]  }
   0x8   :  { %1892 = vmatpush3.bf16.msra.mxu0 %v2215_v6  ;;  %v2224_v15 = vld [vmem:[%s3076_s1 + $0x98] sm:$0xff]   ;;  %v2228_v19 = vld [vmem:[%s3076_s1 + $0xa0] sm:$0xff]   ;;  %v2232_v23 = vld [vmem:[%s3076_s1 + $0xa8] sm:$0xff]  }
   0x9   :  { %1956 = vmatpush3.bf16.msra.mxu1 %v2216_v7  ;;  %1893 = vmatprep.subr.bf16.mxu0 %v2217_v8  ;;  %v2233_v24 = vld [vmem:[%s3076_s1 + $0x70] sm:$0xff]   ;;  %v2237_v28 = vld [vmem:[%s3076_s1 + $0x78] sm:$0xff]   ;;  %v2241_v32 = vld [vmem:[%s3077_s0] ss:$36 sps:$4 sm:$0xff]  }
   0xa   :  { %1957 = vmatprep.subr.bf16.mxu1 %v2218_v9  ;;  %v2234_v25 = vld [vmem:[%s3076_s1 + $0xf0] sm:$0xff]   ;;  %v2238_v29 = vld [vmem:[%s3076_s1 + $0xf8] sm:$0xff]   ;;  %v2243_v33 = vld [vmem:[%s3077_s0 + $0x4] ss:$36 sps:$4 sm:$0xff]  }
   0xb   :  { %v2235_v26 = vld [vmem:[%s3076_s1 + $0x30] sm:$0xff]   ;;  %v2239_v30 = vld [vmem:[%s3076_s1 + $0x38] sm:$0xff]   ;;  %v2244_v34 = vld [vmem:[%s3077_s0 + $0x8] ss:$36 sps:$4 sm:$0xff]   ;;  %1117 = vmatprep.mubr.bf16.mxu0 %v2243_v33 }
   0xc   :  { %1894 = vmatpush3.bf16.msra.mxu0 %v2219_v10  ;;  %v2236_v27 = vld [vmem:[%s3076_s1 + $0xb0] sm:$0xff]   ;;  %v2240_v31 = vld [vmem:[%s3076_s1 + $0xb8] sm:$0xff]   ;;  %v2247_v36 = vld [vmem:[%s3076_s1 + $0x140] sm:$0xff]  }
   0xd   :  { %1958 = vmatpush3.bf16.msra.mxu1 %v2220_v11  ;;  %1895 = vmatprep.subr.bf16.mxu0 %v2221_v12  ;;  %v2246_v35 = vld [vmem:[%s3077_s0 + $0xc] ss:$36 sps:$4 sm:$0xff]   ;;  %v2248_v37 = vld [vmem:[%s3076_s1 + $0x1c0] sm:$0xff]   ;;  %v2253_v41 = vld [vmem:[%s3077_s0 + $0x54] ss:$36 sps:$4 sm:$0xff]  }
   0xe   :  { %1959 = vmatprep.subr.bf16.mxu1 %v2222_v13  ;;  %1214 = vmatprep.mubr.bf16.mxu1 %v2246_v35  ;;  %v2249_v38 = vld [vmem:[%s3076_s1 + $0x100] sm:$0xff]   ;;  %v2251_v40 = vld [vmem:[%s3077_s0 + $0x4c] ss:$36 sps:$4 sm:$0xff]   ;;  %v2261_v48 = vld [vmem:[%s3077_s0 + $0x94] ss:$36 sps:$4 sm:$0xff]  }
   0xf   :  { %v2250_v39 = vld [vmem:[%s3076_s1 + $0x180] sm:$0xff]   ;;  %v2255_v42 = vld [vmem:[%s3077_s0 + $0x48] ss:$36 sps:$4 sm:$0xff]   ;;  %v2256_v43 = vld [vmem:[%s3077_s0 + $0x50] ss:$36 sps:$4 sm:$0xff]  }
  0x10   :  { %1896 = vmatpush3.bf16.msra.mxu0 %v2223_v14  ;;  %v2257_v44 = vld [vmem:[%s3076_s1 + $0x148] sm:$0xff]   ;;  %v2263_v49 = vld [vmem:[%s3077_s0 + $0x9c] ss:$36 sps:$4 sm:$0xff]   ;;  %v2265_v50 = vld [vmem:[%s3077_s0 + $0x90] ss:$36 sps:$4 sm:$0xff]  }
  0x11   :  { %1960 = vmatpush3.bf16.msra.mxu1 %v2224_v15  ;;  %1897 = vmatprep.subr.bf16.mxu0 %v2225_v16  ;;  %v2258_v45 = vld [vmem:[%s3076_s1 + $0x1c8] sm:$0xff]   ;;  %v2266_v51 = vld [vmem:[%s3077_s0 + $0x98] ss:$36 sps:$4 sm:$0xff]   ;;  %v2267_v52 = vld [vmem:[%s3076_s1 + $0x150] sm:$0xff]  }
  0x12   :  { %1961 = vmatprep.subr.bf16.mxu1 %v2226_v17  ;;  %v2259_v46 = vld [vmem:[%s3076_s1 + $0x108] sm:$0xff]   ;;  %v2268_v53 = vld [vmem:[%s3076_s1 + $0x1d0] sm:$0xff]   ;;  %v2271_v56 = vld [vmem:[%s3077_s0 + $0xdc] ss:$36 sps:$4 sm:$0xff]  }
  0x13   :  { %v2260_v47 = vld [vmem:[%s3076_s1 + $0x188] sm:$0xff]   ;;  %v2269_v54 = vld [vmem:[%s3076_s1 + $0x110] sm:$0xff]   ;;  %v2275_v58 = vld [vmem:[%s3077_s0 + $0xd8] ss:$36 sps:$4 sm:$0xff]  }
  0x14   :  { %1898 = vmatpush3.bf16.msra.mxu0 %v2227_v18  ;;  %v2270_v55 = vld [vmem:[%s3076_s1 + $0x190] sm:$0xff]   ;;  %v2273_v57 = vld [vmem:[%s3077_s0 + $0xe4] ss:$36 sps:$4 sm:$0xff]   ;;  %v2277_v60 = vld [vmem:[%s3076_s1 + $0x158] sm:$0xff]  }
  0x15   :  { %1962 = vmatpush3.bf16.msra.mxu1 %v2228_v19  ;;  %1899 = vmatprep.subr.bf16.mxu0 %v2229_v20  ;;  %v2276_v59 = vld [vmem:[%s3077_s0 + $0xe0] ss:$36 sps:$4 sm:$0xff]   ;;  %v2278_v61 = vld [vmem:[%s3076_s1 + $0x1d8] sm:$0xff]   ;;  %v2283_v1 = vld [vmem:[%s3077_s0 + $0x12c] ss:$36 sps:$4 sm:$0xff]  }
  0x16   :  { %1963 = vmatprep.subr.bf16.mxu1 %v2230_v21  ;;  %v2279_v62 = vld [vmem:[%s3076_s1 + $0x118] sm:$0xff]   ;;  %v2281_v0 = vld [vmem:[%s3077_s0 + $0x124] ss:$36 sps:$4 sm:$0xff]   ;;  %v2291_v8 = vld [vmem:[%s3077_s0 + $0x16c] ss:$36 sps:$4 sm:$0xff]  }
  0x17   :  { %v2280_v63 = vld [vmem:[%s3076_s1 + $0x198] sm:$0xff]   ;;  %v2285_v2 = vld [vmem:[%s3077_s0 + $0x120] ss:$36 sps:$4 sm:$0xff]   ;;  %v2286_v4 = vld [vmem:[%s3077_s0 + $0x128] ss:$36 sps:$4 sm:$0xff]  }
  0x18   :  { %1900 = vmatpush3.bf16.msra.mxu0 %v2231_v22  ;;  %v2287_v3 = vld [vmem:[%s3076_s1 + $0x160] sm:$0xff]   ;;  %v2293_v9 = vld [vmem:[%s3077_s0 + $0x174] ss:$36 sps:$4 sm:$0xff]   ;;  %v2297_v10 = vld [vmem:[%s3076_s1 + $0x168] sm:$0xff]  }
  0x19   :  { %1964 = vmatpush3.bf16.msra.mxu1 %v2232_v23  ;;  %1901 = vmatprep.subr.bf16.mxu0 %v2233_v24  ;;  %v2288_v5 = vld [vmem:[%s3076_s1 + $0x1e0] sm:$0xff]   ;;  %v2298_v11 = vld [vmem:[%s3076_s1 + $0x1e8] sm:$0xff]   ;;  %v2296_v15 = vld [vmem:[%s3077_s0 + $0x170] ss:$36 sps:$4 sm:$0xff]  }
  0x1a   :  { %1965 = vmatprep.subr.bf16.mxu1 %v2234_v25  ;;  %v2289_v6 = vld [vmem:[%s3076_s1 + $0x120] sm:$0xff]   ;;  %v2295_v12 = vld [vmem:[%s3077_s0 + $0x168] ss:$36 sps:$4 sm:$0xff]   ;;  %v2301_v16 = vld [vmem:[%s3077_s0 + $0x1b4] ss:$36 sps:$4 sm:$0xff]  }
  0x1b   :  { %v2290_v7 = vld [vmem:[%s3076_s1 + $0x1a0] sm:$0xff]   ;;  %v2299_v13 = vld [vmem:[%s3076_s1 + $0x128] sm:$0xff]   ;;  %v2307_v18 = vld [vmem:[%s3076_s1 + $0x170] sm:$0xff]  }
  0x1c   :  { %1902 = vmatpush3.bf16.msra.mxu0 %v2235_v26  ;;  %v2300_v14 = vld [vmem:[%s3076_s1 + $0x1a8] sm:$0xff]   ;;  %v2303_v17 = vld [vmem:[%s3077_s0 + $0x1bc] ss:$36 sps:$4 sm:$0xff]   ;;  %v2308_v19 = vld [vmem:[%s3076_s1 + $0x1f0] sm:$0xff]  }
  0x1d   :  { %1966 = vmatpush3.bf16.msra.mxu1 %v2236_v27  ;;  %1903 = vmatprep.subr.bf16.mxu0 %v2237_v28  ;;  %v2309_v20 = vld [vmem:[%s3076_s1 + $0x130] sm:$0xff]   ;;  %v2306_v23 = vld [vmem:[%s3077_s0 + $0x1b8] ss:$36 sps:$4 sm:$0xff]   ;;  %v2313_v25 = vld [vmem:[%s3077_s0 + $0x204] ss:$36 sps:$4 sm:$0xff]  }
  0x1e   :  { %1967 = vmatprep.subr.bf16.mxu1 %v2238_v29  ;;  %v2310_v21 = vld [vmem:[%s3076_s1 + $0x1b0] sm:$0xff]   ;;  %v2311_v24 = vld [vmem:[%s3077_s0 + $0x1fc] ss:$36 sps:$4 sm:$0xff]  }
  0x1f   :  { %v2305_v22 = vld [vmem:[%s3077_s0 + $0x1b0] ss:$36 sps:$4 sm:$0xff]   ;;  %v2317_v26 = vld [vmem:[%s3076_s1 + $0x178] sm:$0xff]  }
  0x20   :  { %1904 = vmatpush3.bf16.msra.mxu0 %v2239_v30  ;;  %v2318_v27 = vld [vmem:[%s3076_s1 + $0x1f8] sm:$0xff]   ;;  %v2321_v35 = vld [vmem:[%s3077_s0 + $0x10] ss:$36 sps:$4 sm:$0xff]  }
  0x21   :  { %1968 = vmatpush3.bf16.msra.mxu1 %v2240_v31  ;;  %2017 = vmatprep.subr.bf16.mxu0 %v2247_v36  ;;  %v2319_v28 = vld [vmem:[%s3076_s1 + $0x138] sm:$0xff]   ;;  %v2316_v31 = vld [vmem:[%s3077_s0 + $0x200] ss:$36 sps:$4 sm:$0xff]  }
  0x22   :  { %2081 = vmatprep.subr.bf16.mxu1 %v2248_v37  ;;  %v2320_v29 = vld [vmem:[%s3076_s1 + $0x1b8] sm:$0xff]  }
  0x23   :  { %1118 = vmatmul.mubr.bf16.vlgmr.msra.gmra.mrb[0].mxu0 %v2241_v32  ;;  %v2315_v30 = vld [vmem:[%s3077_s0 + $0x1f8] ss:$36 sps:$4 sm:$0xff]   ;;  %v2327_v32 = vld [vmem:[%s3076_s1 + $0x200] sm:$0xff]  }
  0x24   :  { %1215 = vmatmul.mubr.bf16.vlgmr.msra.gmra.mrb[0].mxu1 %v2244_v34  ;;  %2018 = vmatpush3.bf16.msra.mxu0 %v2249_v38  ;;  %v2323_v33 = vld [vmem:[%s3077_s0 + $0x14] ss:$36 sps:$4 sm:$0xff]   ;;  %v2326_v34 = vld [vmem:[%s3077_s0 + $0x1c] ss:$36 sps:$4 sm:$0xff]   ;;  %v2330_v38 = vld [vmem:[%s3077_s0 + $0x64] ss:$36 sps:$4 sm:$0xff]  }
  0x25   :  { %2082 = vmatpush3.bf16.msra.mxu1 %v2250_v39  ;;  %1125 = vmatprep.mubr.bf16.mxu0 %v2251_v40  ;;  %v2324_v36 = vld [vmem:[%s3077_s0 + $0x18] ss:$36 sps:$4 sm:$0xff]   ;;  %v2334_v39 = vld [vmem:[%s3076_s1 + $0x208] sm:$0xff]   ;;  %v2341_v40 = vld [vmem:[%s3076_s1 + $0x210] sm:$0xff]  }
  0x26   :  { %1222 = vmatprep.mubr.bf16.mxu1 %v2253_v41  ;;  %2019 = vmatprep.subr.bf16.mxu0 %v2257_v44  ;;  %v2328_v37 = vld [vmem:[%s3077_s0 + $0x5c] ss:$36 sps:$4 sm:$0xff]   ;;  %v2337_v44 = vld [vmem:[%s3077_s0 + $0xac] ss:$36 sps:$4 sm:$0xff]  }
  0x27   :  { %2083 = vmatprep.subr.bf16.mxu1 %v2258_v45  ;;  %v2332_v41 = vld [vmem:[%s3077_s0 + $0x58] ss:$36 sps:$4 sm:$0xff]  }
  0x28   :  { %2020 = vmatpush3.bf16.msra.mxu0 %v2259_v46  ;;  %v2348_v45 = vld [vmem:[%s3076_s1 + $0x218] sm:$0xff]   ;;  %v2355_v46 = vld [vmem:[%s3076_s1 + $0x220] sm:$0xff]  }
  0x29   :  { %2084 = vmatpush3.bf16.msra.mxu1 %v2260_v47  ;;  %2021 = vmatprep.subr.bf16.mxu0 %v2267_v52  ;;  %v2339_v47 = vld [vmem:[%s3077_s0 + $0xa0] ss:$36 sps:$4 sm:$0xff]   ;;  %v2346_v52 = vld [vmem:[%s3077_s0 + $0xe8] ss:$36 sps:$4 sm:$0xff]  }
  0x2a   :  { %2085 = vmatprep.subr.bf16.mxu1 %v2268_v53  ;;  %v2369_v53 = vld [vmem:[%s3076_s1 + $0x230] sm:$0xff]  }
  0x2b   :  { %1126 = vmatmul.mubr.bf16.gmra.mrb[4].mxu0 %v2255_v42  ;;  %v2333_v42 = vld [vmem:[%s3077_s0 + $0x60] ss:$36 sps:$4 sm:$0xff]  }
  0x2c   :  { %1223 = vmatmul.mubr.bf16.gmra.mrb[4].mxu1 %v2256_v43  ;;  %1133 = vmatprep.mubr.bf16.mxu0 %v2261_v48  ;;  %v2335_v43 = vld [vmem:[%s3077_s0 + $0xa4] ss:$36 sps:$4 sm:$0xff]  }
  0x2d   :  { %1230 = vmatprep.mubr.bf16.mxu1 %v2263_v49  ;;  %2022 = vmatpush3.bf16.msra.mxu0 %v2269_v54  ;;  %v2340_v48 = vld [vmem:[%s3077_s0 + $0xa8] ss:$36 sps:$4 sm:$0xff]   ;;  %v2347_v54 = vld [vmem:[%s3077_s0 + $0xf0] ss:$36 sps:$4 sm:$0xff]  }
  0x2e   :  { %2086 = vmatpush3.bf16.msra.mxu1 %v2270_v55  ;;  %2023 = vmatprep.subr.bf16.mxu0 %v2277_v60  ;;  %v2342_v49 = vld [vmem:[%s3077_s0 + $0xec] ss:$36 sps:$4 sm:$0xff]   ;;  %v2349_v55 = vld [vmem:[%s3077_s0 + $0x134] ss:$36 sps:$4 sm:$0xff]   ;;  %v2356_v60 = vld [vmem:[%s3077_s0 + $0x17c] ss:$36 sps:$4 sm:$0xff]  }
  0x2f   :  { %2087 = vmatprep.subr.bf16.mxu1 %v2278_v61  ;;  %v2358_v61 = vld [vmem:[%s3077_s0 + $0x184] ss:$36 sps:$4 sm:$0xff]  }
  0x31   :  { %2024 = vmatpush3.bf16.msra.mxu0 %v2279_v62  ;;  %v2360_v62 = vld [vmem:[%s3077_s0 + $0x178] ss:$36 sps:$4 sm:$0xff]  }
  0x32   :  { %2088 = vmatpush3.bf16.msra.mxu1 %v2280_v63  ;;  %2025 = vmatprep.subr.bf16.mxu0 %v2287_v3  ;;  %v2361_v63 = vld [vmem:[%s3077_s0 + $0x180] ss:$36 sps:$4 sm:$0xff]   ;;  %v2368_v3 = vld [vmem:[%s3077_s0 + $0x1c8] ss:$36 sps:$4 sm:$0xff]  }
  0x33   :  { %1134 = vmatmul.mubr.bf16.gmra.mrb[8].mxu0 %v2265_v50  ;;  %2089 = vmatprep.subr.bf16.mxu1 %v2288_v5  ;;  %v2344_v50 = vld [vmem:[%s3077_s0 + $0xf4] ss:$36 sps:$4 sm:$0xff]  }
  0x34   :  { %1231 = vmatmul.mubr.bf16.gmra.mrb[8].mxu1 %v2266_v51  ;;  %1141 = vmatprep.mubr.bf16.mxu0 %v2271_v56  ;;  %v2362_v51 = vld [vmem:[%s3076_s1 + $0x228] sm:$0xff]   ;;  %v2351_v56 = vld [vmem:[%s3077_s0 + $0x13c] ss:$36 sps:$4 sm:$0xff]   ;;  %v2372_v5 = vld [vmem:[%s3077_s0 + $0x214] ss:$36 sps:$4 sm:$0xff]  }
  0x35   :  { %1238 = vmatprep.mubr.bf16.mxu1 %v2273_v57  ;;  %2026 = vmatpush3.bf16.msra.mxu0 %v2289_v6  ;;  %v2376_v57 = vld [vmem:[%s3076_s1 + $0x238] sm:$0xff]   ;;  %v2374_v6 = vld [vmem:[%s3077_s0 + $0x208] ss:$36 sps:$4 sm:$0xff]  }
  0x36   :  { %2090 = vmatpush3.bf16.msra.mxu1 %v2290_v7  ;;  %2027 = vmatprep.subr.bf16.mxu0 %v2297_v10  ;;  %v2375_v7 = vld [vmem:[%s3077_s0 + $0x210] ss:$36 sps:$4 sm:$0xff]   ;;  %v2379_v10 = vld [vmem:[%s3077_s0 + $0x68] ss:$36 sps:$4 sm:$0xff]  }
  0x37   :  { %2091 = vmatprep.subr.bf16.mxu1 %v2298_v11  ;;  %v2380_v11 = vld [vmem:[%s3077_s0 + $0x188] ss:$36 sps:$4 sm:$0xff]  }
  0x39   :  { %2028 = vmatpush3.bf16.msra.mxu0 %v2299_v13  ;;  %v2382_v13 = vld [vmem:[%s3077_s0 + $0x1d0] ss:$36 sps:$4 sm:$0xff]  }
  0x3a   :  { %2092 = vmatpush3.bf16.msra.mxu1 %v2300_v14  ;;  %2029 = vmatprep.subr.bf16.mxu0 %v2307_v18  ;;  %v2383_v14 = vld [vmem:[%s3077_s0 + $0xf8] ss:$36 sps:$4 sm:$0xff]  }
  0x3b   :  { %1142 = vmatmul.mubr.bf16.gmra.mrb[12].mxu0 %v2275_v58  ;;  %2093 = vmatprep.subr.bf16.mxu1 %v2308_v19  ;;  %v2353_v58 = vld [vmem:[%s3077_s0 + $0x130] ss:$36 sps:$4 sm:$0xff]  }
  0x3c   :  { %1239 = vmatmul.mubr.bf16.gmra.mrb[12].mxu1 %v2276_v59  ;;  %1149 = vmatprep.mubr.bf16.mxu0 %v2281_v0  ;;  %v2354_v59 = vld [vmem:[%s3077_s0 + $0x138] ss:$36 sps:$4 sm:$0xff]   ;;  %v2363_v0 = vld [vmem:[%s3077_s0 + $0x1c4] ss:$36 sps:$4 sm:$0xff]  }
  0x3d   :  { %1246 = vmatprep.mubr.bf16.mxu1 %v2283_v1  ;;  %2030 = vmatpush3.bf16.msra.mxu0 %v2309_v20  ;;  %v2365_v1 = vld [vmem:[%s3077_s0 + $0x1cc] ss:$36 sps:$4 sm:$0xff]  }
  0x3e   :  { %2094 = vmatpush3.bf16.msra.mxu1 %v2310_v21  ;;  %2031 = vmatprep.subr.bf16.mxu0 %v2317_v26 }
  0x3f   :  { %2095 = vmatprep.subr.bf16.mxu1 %v2318_v27 }
  0x41   :  { %2032 = vmatpush3.bf16.msra.mxu0 %v2319_v28 }
  0x42   :  { %2096 = vmatpush3.bf16.msra.mxu1 %v2320_v29  ;;  %2161 = vmatprep.subr.bf16.mxu0 %v2327_v32 }
  0x43   :  { %1150 = vmatmul.mubr.bf16.gmra.mrb[16].mxu0 %v2285_v2  ;;  %2193 = vmatprep.subr.bf16.mxu1 %v2327_v32  ;;  %v2367_v2 = vld [vmem:[%s3077_s0 + $0x1c0] ss:$36 sps:$4 sm:$0xff]  }
  0x44   :  { %1247 = vmatmul.mubr.bf16.gmra.mrb[16].mxu1 %v2286_v4  ;;  %1157 = vmatprep.mubr.bf16.mxu0 %v2291_v8  ;;  %v2370_v4 = vld [vmem:[%s3077_s0 + $0x20c] ss:$36 sps:$4 sm:$0xff]   ;;  %v2377_v8 = vld [vmem:[%s3077_s0 + $0x20] ss:$36 sps:$4 sm:$0xff]  }
  0x45   :  { %1254 = vmatprep.mubr.bf16.mxu1 %v2293_v9  ;;  %v2378_v9 = vld [vmem:[%s3077_s0 + $0x140] ss:$36 sps:$4 sm:$0xff]  }
  0x4b   :  { %1158 = vmatmul.mubr.bf16.gmra.mrb[20].mxu0 %v2295_v12  ;;  %v2381_v12 = vld [vmem:[%s3077_s0 + $0xb0] ss:$36 sps:$4 sm:$0xff]  }
  0x4c   :  { %1255 = vmatmul.mubr.bf16.gmra.mrb[20].mxu1 %v2296_v15  ;;  %1165 = vmatprep.mubr.bf16.mxu0 %v2301_v16  ;;  %v2384_v15 = vld [vmem:[%s3077_s0 + $0x218] ss:$36 sps:$4 sm:$0xff]  }
  0x4d   :  { %1262 = vmatprep.mubr.bf16.mxu1 %v2303_v17 }
  0x53   :  { %1166 = vmatmul.mubr.bf16.gmra.mrb[24].mxu0 %v2305_v22 }
  0x54   :  { %1263 = vmatmul.mubr.bf16.gmra.mrb[24].mxu1 %v2306_v23  ;;  %1173 = vmatprep.mubr.bf16.mxu0 %v2311_v24 }
  0x55   :  { %1270 = vmatprep.mubr.bf16.mxu1 %v2313_v25 }
  0x5b   :  { %1174 = vmatmul.mubr.bf16.gmra.mrb[28].mxu0 %v2315_v30 }
  0x5c   :  { %1271 = vmatmul.mubr.bf16.gmra.mrb[28].mxu1 %v2316_v31  ;;  %1311 = vmatprep.mubr.bf16.mxu0 %v2323_v33 }
  0x5d   :  { %1408 = vmatprep.mubr.bf16.mxu1 %v2326_v34 }
  0x63   :  { %1312 = vmatmul.mubr.bf16.vlgmr.msra.gmra.mrb[32].mxu0 %v2321_v35 }
  0x64   :  { %1409 = vmatmul.mubr.bf16.vlgmr.msra.gmra.mrb[32].mxu1 %v2324_v36  ;;  %2162 = vmatpush3.bf16.msra.mxu0 %v2327_v32 }
  0x65   :  { %2201 = vmatpush3.bf16.msra.mxu1 %v2327_v32  ;;  %1319 = vmatprep.mubr.bf16.mxu0 %v2328_v37 }
  0x66   :  { %1416 = vmatprep.mubr.bf16.mxu1 %v2330_v38  ;;  %2163 = vmatprep.subr.bf16.mxu0 %v2334_v39 }
  0x67   :  { %2194 = vmatprep.subr.bf16.mxu1 %v2334_v39 }
  0x68   :  { %2164 = vmatpush3.bf16.msra.mxu0 %v2334_v39 }
  0x69   :  { %2202 = vmatpush3.bf16.msra.mxu1 %v2334_v39  ;;  %2165 = vmatprep.subr.bf16.mxu0 %v2341_v40 }
  0x6a   :  { %2195 = vmatprep.subr.bf16.mxu1 %v2341_v40 }
  0x6b   :  { %1320 = vmatmul.mubr.bf16.gmra.mrb[36].mxu0 %v2332_v41 }
  0x6c   :  { %1417 = vmatmul.mubr.bf16.gmra.mrb[36].mxu1 %v2333_v42  ;;  %1327 = vmatprep.mubr.bf16.mxu0 %v2335_v43 }
  0x6d   :  { %1424 = vmatprep.mubr.bf16.mxu1 %v2337_v44  ;;  %2166 = vmatpush3.bf16.msra.mxu0 %v2341_v40 }
  0x6e   :  { %2203 = vmatpush3.bf16.msra.mxu1 %v2341_v40  ;;  %2167 = vmatprep.subr.bf16.mxu0 %v2348_v45 }
  0x6f   :  { %2196 = vmatprep.subr.bf16.mxu1 %v2348_v45 }
  0x71   :  { %2168 = vmatpush3.bf16.msra.mxu0 %v2348_v45 }
  0x72   :  { %2204 = vmatpush3.bf16.msra.mxu1 %v2348_v45  ;;  %2169 = vmatprep.subr.bf16.mxu0 %v2355_v46 }
  0x73   :  { %1328 = vmatmul.mubr.bf16.gmra.mrb[40].mxu0 %v2339_v47  ;;  %2197 = vmatprep.subr.bf16.mxu1 %v2355_v46 }
  0x74   :  { %1425 = vmatmul.mubr.bf16.gmra.mrb[40].mxu1 %v2340_v48  ;;  %1335 = vmatprep.mubr.bf16.mxu0 %v2342_v49 }
  0x75   :  { %1432 = vmatprep.mubr.bf16.mxu1 %v2344_v50  ;;  %2170 = vmatpush3.bf16.msra.mxu0 %v2355_v46 }
  0x76   :  { %2205 = vmatpush3.bf16.msra.mxu1 %v2355_v46  ;;  %2171 = vmatprep.subr.bf16.mxu0 %v2362_v51 }
  0x77   :  { %2198 = vmatprep.subr.bf16.mxu1 %v2362_v51 }
  0x79   :  { %2172 = vmatpush3.bf16.msra.mxu0 %v2362_v51 }
  0x7a   :  { %2206 = vmatpush3.bf16.msra.mxu1 %v2362_v51  ;;  %2173 = vmatprep.subr.bf16.mxu0 %v2369_v53 }
  0x7b   :  { %1336 = vmatmul.mubr.bf16.gmra.mrb[44].mxu0 %v2346_v52  ;;  %2199 = vmatprep.subr.bf16.mxu1 %v2369_v53 }
  0x7c   :  { %1433 = vmatmul.mubr.bf16.gmra.mrb[44].mxu1 %v2347_v54  ;;  %1343 = vmatprep.mubr.bf16.mxu0 %v2349_v55 }
  0x7d   :  { %1440 = vmatprep.mubr.bf16.mxu1 %v2351_v56  ;;  %2174 = vmatpush3.bf16.msra.mxu0 %v2369_v53 }
  0x7e   :  { %2207 = vmatpush3.bf16.msra.mxu1 %v2369_v53  ;;  %2175 = vmatprep.subr.bf16.mxu0 %v2376_v57 }
  0x7f   :  { %2200 = vmatprep.subr.bf16.mxu1 %v2376_v57 }
  0x81   :  { %2176 = vmatpush3.bf16.msra.mxu0 %v2376_v57 }
  0x82   :  { %2208 = vmatpush3.bf16.msra.mxu1 %v2376_v57 }
  0x83   :  { %1344 = vmatmul.mubr.bf16.gmra.mrb[48].mxu0 %v2353_v58 }
  0x84   :  { %1441 = vmatmul.mubr.bf16.gmra.mrb[48].mxu1 %v2354_v59  ;;  %1351 = vmatprep.mubr.bf16.mxu0 %v2356_v60 }
  0x85   :  { %1448 = vmatprep.mubr.bf16.mxu1 %v2358_v61 }
  0x8b   :  { %1352 = vmatmul.mubr.bf16.gmra.mrb[52].mxu0 %v2360_v62 }
  0x8c   :  { %1449 = vmatmul.mubr.bf16.gmra.mrb[52].mxu1 %v2361_v63  ;;  %1359 = vmatprep.mubr.bf16.mxu0 %v2363_v0 }
  0x8d   :  { %1456 = vmatprep.mubr.bf16.mxu1 %v2365_v1 }
  0x93   :  { %1360 = vmatmul.mubr.bf16.gmra.mrb[56].mxu0 %v2367_v2 }
  0x94   :  { %1457 = vmatmul.mubr.bf16.gmra.mrb[56].mxu1 %v2368_v3  ;;  %1367 = vmatprep.mubr.bf16.mxu0 %v2370_v4 }
  0x95   :  { %1464 = vmatprep.mubr.bf16.mxu1 %v2372_v5 }
  0x9b   :  { %1368 = vmatmul.mubr.bf16.gmra.mrb[60].mxu0 %v2374_v6 }
  0x9c   :  { %1465 = vmatmul.mubr.bf16.gmra.mrb[60].mxu1 %v2375_v7  ;;  %2177 = vmatprep.mubr.bf16.mxu0 %v2377_v8 }
  0x9d   :  { %2185 = vmatprep.mubr.bf16.mxu1 %v2378_v9 }
  0xa3   :  { %2178 = vmatmul.mubr.bf16.vlgmr.msra.gmra.mrb[64].mxu0 %v2379_v10 }
  0xa4   :  { %2186 = vmatmul.mubr.bf16.vlgmr.msra.gmra.mrb[64].mxu1 %v2380_v11  ;;  %2181 = vmatprep.mubr.bf16.mxu0 %v2381_v12 }
  0xa5   :  { %2189 = vmatprep.mubr.bf16.mxu1 %v2382_v13 }
  0xab   :  { %2182 = vmatmul.mubr.bf16.gmra.mrb[68].mxu0 %v2383_v14 }
  0xac   :  { %2190 = vmatmul.mubr.bf16.gmra.mrb[68].mxu1 %v2384_v15 }
  0xf6   :  { %v1905_v16 = vpop.f32.mrb[0].mxu0 }
  0xf7   :  { %v1969_v17 = vpop.f32.mrb[0].mxu1  ;;  %v1906_v18 = vpop.f32.mrb[1].mxu0 }
  0xf8   :  { %v1907_v19 = vadd.f32 %v1906_v18, %v1905_v16  ;;  %v1970_v20 = vpop.f32.mrb[1].mxu1  ;;  %v1908_v21 = vpop.f32.mrb[2].mxu0 }
  0xf9   :  { %v1971_v22 = vadd.f32 %v1970_v20, %v1969_v17  ;;  %v1972_v23 = vpop.f32.mrb[2].mxu1  ;;  %v1909_v24 = vpop.f32.mrb[3].mxu0 }
  0xfa   :  { %v1910_v25 = vadd.f32 %v1909_v24, %v1908_v21  ;;  %v1973_v26 = vpop.f32.mrb[3].mxu1 }
  0xfb   :  { %v2842_v27 = vadd.f32 %v1971_v22, %v1907_v19  ;;  %v1974_v28 = vadd.f32 %v1973_v26, %v1972_v23 }
  0xfd   :  { %v2844_v29 = vadd.f32 %v1974_v28, %v1910_v25 }
  0xfe   :  { %v1911_v30 = vpop.f32.mrb[4].mxu0 }
  0xff   :  { %v1975_v31 = vpop.f32.mrb[4].mxu1  ;;  %v1912_v32 = vpop.f32.mrb[5].mxu0 }
 0x100   :  { %v1913_v33 = vadd.f32 %v1912_v32, %v1911_v30  ;;  %v1976_v34 = vpop.f32.mrb[5].mxu1  ;;  %v1914_v35 = vpop.f32.mrb[6].mxu0 }
 0x101   :  { %v1977_v36 = vadd.f32 %v1976_v34, %v1975_v31  ;;  %v1978_v37 = vpop.f32.mrb[6].mxu1  ;;  %v1915_v38 = vpop.f32.mrb[7].mxu0 }
 0x102   :  { %v1916_v39 = vadd.f32 %v1915_v38, %v1914_v35  ;;  %v1979_v40 = vpop.f32.mrb[7].mxu1 }
 0x103   :  { %v2846_v41 = vadd.f32 %v1977_v36, %v1913_v33  ;;  %v1980_v42 = vadd.f32 %v1979_v40, %v1978_v37 }
 0x105   :  { %v2848_v43 = vadd.f32 %v1980_v42, %v1916_v39 }
 0x106   :  { %v1917_v44 = vpop.f32.mrb[8].mxu0 }
 0x107   :  { %v1981_v45 = vpop.f32.mrb[8].mxu1  ;;  %v1918_v46 = vpop.f32.mrb[9].mxu0 }
 0x108   :  { %v1919_v47 = vadd.f32 %v1918_v46, %v1917_v44  ;;  %v1982_v48 = vpop.f32.mrb[9].mxu1  ;;  %v1920_v49 = vpop.f32.mrb[10].mxu0 }
 0x109   :  { %v1983_v50 = vadd.f32 %v1982_v48, %v1981_v45  ;;  %v1984_v51 = vpop.f32.mrb[10].mxu1  ;;  %v1921_v52 = vpop.f32.mrb[11].mxu0 }
 0x10a   :  { %v1922_v53 = vadd.f32 %v1921_v52, %v1920_v49  ;;  %v1985_v54 = vpop.f32.mrb[11].mxu1 }
 0x10b   :  { %v2850_v55 = vadd.f32 %v1983_v50, %v1919_v47  ;;  %v1986_v56 = vadd.f32 %v1985_v54, %v1984_v51 }
 0x10d   :  { %v2852_v57 = vadd.f32 %v1986_v56, %v1922_v53 }
 0x10e   :  { %v1923_v58 = vpop.f32.mrb[12].mxu0 }
 0x10f   :  { %v1987_v59 = vpop.f32.mrb[12].mxu1  ;;  %v1924_v60 = vpop.f32.mrb[13].mxu0 }
 0x110   :  { %v1925_v61 = vadd.f32 %v1924_v60, %v1923_v58  ;;  %v1988_v62 = vpop.f32.mrb[13].mxu1  ;;  %v1926_v63 = vpop.f32.mrb[14].mxu0 }
 0x111   :  { %v1989_v0 = vadd.f32 %v1988_v62, %v1987_v59  ;;  %v1990_v1 = vpop.f32.mrb[14].mxu1  ;;  %v1927_v2 = vpop.f32.mrb[15].mxu0 }
 0x112   :  { %v1928_v3 = vadd.f32 %v1927_v2, %v1926_v63  ;;  %v1991_v4 = vpop.f32.mrb[15].mxu1 }
 0x113   :  { %v2854_v5 = vadd.f32 %v1989_v0, %v1925_v61  ;;  %v1992_v6 = vadd.f32 %v1991_v4, %v1990_v1 }
 0x115   :  { %v2856_v7 = vadd.f32 %v1992_v6, %v1928_v3 }
 0x116   :  { %v1929_v8 = vpop.f32.mrb[16].mxu0 }
 0x117   :  { %v1993_v9 = vpop.f32.mrb[16].mxu1  ;;  %v1930_v10 = vpop.f32.mrb[17].mxu0 }
 0x118   :  { %v1931_v11 = vadd.f32 %v1930_v10, %v1929_v8  ;;  %v1994_v12 = vpop.f32.mrb[17].mxu1  ;;  %v1932_v13 = vpop.f32.mrb[18].mxu0 }
 0x119   :  { %v1995_v14 = vadd.f32 %v1994_v12, %v1993_v9  ;;  %v1996_v15 = vpop.f32.mrb[18].mxu1  ;;  %v1933_v16 = vpop.f32.mrb[19].mxu0 }
 0x11a   :  { %v1934_v17 = vadd.f32 %v1933_v16, %v1932_v13  ;;  %v1997_v18 = vpop.f32.mrb[19].mxu1 }
 0x11b   :  { %v2858_v19 = vadd.f32 %v1995_v14, %v1931_v11  ;;  %v1998_v20 = vadd.f32 %v1997_v18, %v1996_v15 }
 0x11d   :  { %v2860_v21 = vadd.f32 %v1998_v20, %v1934_v17 }
 0x11e   :  { %v1935_v22 = vpop.f32.mrb[20].mxu0 }
 0x11f   :  { %v1999_v23 = vpop.f32.mrb[20].mxu1  ;;  %v1936_v24 = vpop.f32.mrb[21].mxu0 }
 0x120   :  { %v1937_v25 = vadd.f32 %v1936_v24, %v1935_v22  ;;  %v2000_v26 = vpop.f32.mrb[21].mxu1  ;;  %v1938_v28 = vpop.f32.mrb[22].mxu0 }
 0x121   :  { %v2001_v30 = vadd.f32 %v2000_v26, %v1999_v23  ;;  %v2002_v31 = vpop.f32.mrb[22].mxu1  ;;  %v1939_v32 = vpop.f32.mrb[23].mxu0 }
 0x122   :  { %v1940_v33 = vadd.f32 %v1939_v32, %v1938_v28  ;;  %v2003_v34 = vpop.f32.mrb[23].mxu1 }
 0x123   :  { %v2862_v35 = vadd.f32 %v2001_v30, %v1937_v25  ;;  %v2004_v36 = vadd.f32 %v2003_v34, %v2002_v31 }
 0x125   :  { %v2864_v37 = vadd.f32 %v2004_v36, %v1940_v33 }
 0x126   :  { %v1941_v38 = vpop.f32.mrb[24].mxu0 }
 0x127   :  { %v2005_v39 = vpop.f32.mrb[24].mxu1  ;;  %v1942_v40 = vpop.f32.mrb[25].mxu0 }
 0x128   :  { %v1943_v42 = vadd.f32 %v1942_v40, %v1941_v38  ;;  %v2006_v44 = vpop.f32.mrb[25].mxu1  ;;  %v1944_v45 = vpop.f32.mrb[26].mxu0 }
 0x129   :  { %v2007_v46 = vadd.f32 %v2006_v44, %v2005_v39  ;;  %v2008_v47 = vpop.f32.mrb[26].mxu1  ;;  %v1945_v48 = vpop.f32.mrb[27].mxu0 }
 0x12a   :  { %v1946_v49 = vadd.f32 %v1945_v48, %v1944_v45  ;;  %v2009_v50 = vpop.f32.mrb[27].mxu1 }
 0x12b   :  { %v2866_v51 = vadd.f32 %v2007_v46, %v1943_v42  ;;  %v2010_v52 = vadd.f32 %v2009_v50, %v2008_v47 }
 0x12d   :  { %v2868_v53 = vadd.f32 %v2010_v52, %v1946_v49 }
 0x12e   :  { %v1947_v54 = vpop.f32.mrb[28].mxu0 }
 0x12f   :  { %v2011_v56 = vpop.f32.mrb[28].mxu1  ;;  %v1948_v58 = vpop.f32.mrb[29].mxu0 }
 0x130   :  { %v1949_v59 = vadd.f32 %v1948_v58, %v1947_v54  ;;  %v2012_v60 = vpop.f32.mrb[29].mxu1  ;;  %v1950_v61 = vpop.f32.mrb[30].mxu0 }
 0x131   :  { %v2013_v62 = vadd.f32 %v2012_v60, %v2011_v56  ;;  %v2014_v63 = vpop.f32.mrb[30].mxu1  ;;  %v1951_v0 = vpop.f32.mrb[31].mxu0 }
 0x132   :  { %v1952_v1 = vadd.f32 %v1951_v0, %v1950_v61  ;;  %v2015_v2 = vpop.f32.mrb[31].mxu1 }
 0x133   :  { %v2870_v3 = vadd.f32 %v2013_v62, %v1949_v59  ;;  %v2016_v4 = vadd.f32 %v2015_v2, %v2014_v63 }
 0x135   :  { %v2872_v6 = vadd.f32 %v2016_v4, %v1952_v1 }
 0x136   :  { %v2033_v8 = vpop.f32.mrb[32].mxu0 }
 0x137   :  { %v2097_v9 = vpop.f32.mrb[32].mxu1  ;;  %v2034_v10 = vpop.f32.mrb[33].mxu0 }
 0x138   :  { %v2035_v11 = vadd.f32 %v2034_v10, %v2033_v8  ;;  %v2098_v12 = vpop.f32.mrb[33].mxu1  ;;  %v2036_v13 = vpop.f32.mrb[34].mxu0 }
 0x139   :  { %v2099_v14 = vadd.f32 %v2098_v12, %v2097_v9  ;;  %v2100_v15 = vpop.f32.mrb[34].mxu1  ;;  %v2037_v16 = vpop.f32.mrb[35].mxu0 }
 0x13a   :  { %v1314_v17 = vadd.f32 %v2035_v11, %v2842_v27  ;;  %v2038_v18 = vadd.f32 %v2037_v16, %v2036_v13  ;;  %v2101_v20 = vpop.f32.mrb[35].mxu1 }
 0x13b   :  { %v2102_v22 = vadd.f32 %v2101_v20, %v2100_v15 }
 0x13c   :  { %v1317_v23 = vadd.f32 %v2038_v18, %v2844_v29  ;;  %v2876_v24 = vadd.f32 %v2099_v14, %v1314_v17 }
 0x13e   :  { %v2039_v25 = vpop.f32.mrb[36].mxu0  ;;  %v2878_v26 = vadd.f32 %v2102_v22, %v1317_v23 }
 0x13f   :  { %v2103_v28 = vpop.f32.mrb[36].mxu1  ;;  %v2040_v30 = vpop.f32.mrb[37].mxu0 }
 0x140   :  { %v2041_v31 = vadd.f32 %v2040_v30, %v2039_v25  ;;  %v2104_v32 = vpop.f32.mrb[37].mxu1  ;;  %v2042_v33 = vpop.f32.mrb[38].mxu0 }
 0x141   :  { %v2105_v34 = vadd.f32 %v2104_v32, %v2103_v28  ;;  %v2106_v36 = vpop.f32.mrb[38].mxu1  ;;  %v2043_v38 = vpop.f32.mrb[39].mxu0 }
 0x142   :  { %v1322_v27 = vadd.f32 %v2041_v31, %v2846_v41  ;;  %v2044_v39 = vadd.f32 %v2043_v38, %v2042_v33  ;;  %v2107_v40 = vpop.f32.mrb[39].mxu1 }
 0x143   :  { %v2108_v42 = vadd.f32 %v2107_v40, %v2106_v36 }
 0x144   :  { %v1325_v29 = vadd.f32 %v2044_v39, %v2848_v43  ;;  %v2882_v44 = vadd.f32 %v2105_v34, %v1322_v27 }
 0x146   :  { %v2045_v45 = vpop.f32.mrb[40].mxu0  ;;  %v2884_v46 = vadd.f32 %v2108_v42, %v1325_v29 }
 0x147   :  { %v2109_v47 = vpop.f32.mrb[40].mxu1  ;;  %v2046_v48 = vpop.f32.mrb[41].mxu0 }
 0x148   :  { %v2047_v49 = vadd.f32 %v2046_v48, %v2045_v45  ;;  %v2110_v50 = vpop.f32.mrb[41].mxu1  ;;  %v2048_v52 = vpop.f32.mrb[42].mxu0 }
 0x149   :  { %v2111_v54 = vadd.f32 %v2110_v50, %v2109_v47  ;;  %v2112_v56 = vpop.f32.mrb[42].mxu1  ;;  %v2049_v58 = vpop.f32.mrb[43].mxu0 }
 0x14a   :  { %v1330_v41 = vadd.f32 %v2047_v49, %v2850_v55  ;;  %v2050_v59 = vadd.f32 %v2049_v58, %v2048_v52  ;;  %v2113_v60 = vpop.f32.mrb[43].mxu1 }
 0x14b   :  { %v2114_v61 = vadd.f32 %v2113_v60, %v2112_v56 }
 0x14c   :  { %v1333_v43 = vadd.f32 %v2050_v59, %v2852_v57  ;;  %v2888_v62 = vadd.f32 %v2111_v54, %v1330_v41 }
 0x14e   :  { %v2051_v63 = vpop.f32.mrb[44].mxu0  ;;  %v2890_v0 = vadd.f32 %v2114_v61, %v1333_v43 }
 0x14f   :  { %v2115_v1 = vpop.f32.mrb[44].mxu1  ;;  %v2052_v2 = vpop.f32.mrb[45].mxu0 }
 0x150   :  { %v2053_v4 = vadd.f32 %v2052_v2, %v2051_v63  ;;  %v2116_v8 = vpop.f32.mrb[45].mxu1  ;;  %v2054_v9 = vpop.f32.mrb[46].mxu0 }
 0x151   :  { %v2117_v10 = vadd.f32 %v2116_v8, %v2115_v1  ;;  %v2118_v11 = vpop.f32.mrb[46].mxu1  ;;  %v2055_v12 = vpop.f32.mrb[47].mxu0 }
 0x152   :  { %v1338_v55 = vadd.f32 %v2053_v4, %v2854_v5  ;;  %v2056_v13 = vadd.f32 %v2055_v12, %v2054_v9  ;;  %v2119_v14 = vpop.f32.mrb[47].mxu1 }
 0x153   :  { %v2120_v15 = vadd.f32 %v2119_v14, %v2118_v11 }
 0x154   :  { %v1341_v57 = vadd.f32 %v2056_v13, %v2856_v7  ;;  %v2894_v16 = vadd.f32 %v2117_v10, %v1338_v55 }
 0x156   :  { %v2057_v17 = vpop.f32.mrb[48].mxu0  ;;  %v2896_v18 = vadd.f32 %v2120_v15, %v1341_v57 }
 0x157   :  { %v2121_v20 = vpop.f32.mrb[48].mxu1  ;;  %v2058_v22 = vpop.f32.mrb[49].mxu0 }
 0x158   :  { %v2059_v23 = vadd.f32 %v2058_v22, %v2057_v17  ;;  %v2122_v25 = vpop.f32.mrb[49].mxu1  ;;  %v2060_v28 = vpop.f32.mrb[50].mxu0  ;;  %v2917_v22 = vld [vmem:[%s3078_s3 + $0x8] sm:$0xff]  }
 0x159   :  { %v2123_v30 = vadd.f32 %v2122_v25, %v2121_v20  ;;  %v2124_v31 = vpop.f32.mrb[50].mxu1  ;;  %v2061_v32 = vpop.f32.mrb[51].mxu0 }
 0x15a   :  { %v1346_v5 = vadd.f32 %v2059_v23, %v2858_v19  ;;  %v2062_v33 = vadd.f32 %v2061_v32, %v2060_v28  ;;  %v2125_v34 = vpop.f32.mrb[51].mxu1  ;;  %v2927_v28 = vld [vmem:[%s3078_s3] sm:$0xff]  }
 0x15b   :  { %v2126_v36 = vadd.f32 %v2125_v34, %v2124_v31  ;;  %v1856_v34 = vunpack.c.l.bf16 %v2917_v22 }
 0x15c   :  { %v1349_v7 = vadd.f32 %v2062_v33, %v2860_v21  ;;  %v2900_v38 = vadd.f32 %v2123_v30, %v1346_v5  ;;  %v2933_v5 = vld [vmem:[%s3078_s3 + $0x20] sm:$0xff]  }
 0x15e   :  { %v2063_v27 = vpop.f32.mrb[52].mxu0  ;;  %v2902_v39 = vadd.f32 %v2126_v36, %v1349_v7  ;;  %v2939_v36 = vld [vmem:[%s3078_s3 + $0x18] sm:$0xff]  }
 0x15f   :  { %v2127_v40 = vpop.f32.mrb[52].mxu1  ;;  %v2064_v42 = vpop.f32.mrb[53].mxu0  ;;  %v2944_v7 = vld [vmem:[%s3078_s3 + $0x38] sm:$0xff]  }
 0x160   :  { %v2065_v29 = vadd.f32 %v2064_v42, %v2063_v27  ;;  %v2128_v45 = vpop.f32.mrb[53].mxu1  ;;  %v2066_v47 = vpop.f32.mrb[54].mxu0 }
 0x161   :  { %v2129_v48 = vadd.f32 %v2128_v45, %v2127_v40  ;;  %v2130_v49 = vpop.f32.mrb[54].mxu1  ;;  %v2067_v50 = vpop.f32.mrb[55].mxu0  ;;  %v1852_v40 = vunpack.c.l.bf16 %v2927_v28  ;;  %v2959_v45 = vld [vmem:[%s3078_s3 + $0x30] sm:$0xff]  }
 0x162   :  { %v1354_v19 = vadd.f32 %v2065_v29, %v2862_v35  ;;  %v2068_v52 = vadd.f32 %v2067_v50, %v2066_v47  ;;  %v2131_v54 = vpop.f32.mrb[55].mxu1  ;;  %v2954_v29 = vld [vmem:[%s3078_s3 + $0x10] sm:$0xff]   ;;  %v1868_v47 = vunpack.c.l.bf16 %v2933_v5  ;;  %v2968_v50 = vld [vmem:[%s3079_s2] ss:$0 sm:$0xff] }
 0x163   :  { %v2132_v56 = vadd.f32 %v2131_v54, %v2130_v49  ;;  %v1853_v49 = vunpack.c.h.bf16 %v2927_v28  ;;  %v1864_v54 = vunpack.c.l.bf16 %v2939_v36 }
 0x164   :  { %v1357_v21 = vadd.f32 %v2068_v52, %v2864_v37  ;;  %v1451_v58 = vadd.f32 %v2129_v48, %v1354_v19  ;;  %v1869_v52 = vunpack.c.h.bf16 %v2933_v5 }
 0x166   :  { %v2069_v41 = vpop.f32.mrb[56].mxu0  ;;  %v2906_v59 = vadd.f32 %v2132_v56, %v1357_v21  ;;  %v1880_v56 = vunpack.c.l.bf16 %v2944_v7 }
 0x167   :  { %v2133_v60 = vpop.f32.mrb[56].mxu1  ;;  %v2070_v61 = vpop.f32.mrb[57].mxu0 }
 0x168   :  { %v2071_v43 = vadd.f32 %v2070_v61, %v2069_v41  ;;  %v2134_v63 = vpop.f32.mrb[57].mxu1  ;;  %v2072_v1 = vpop.f32.mrb[58].mxu0 }
 0x169   :  { %v2135_v2 = vadd.f32 %v2134_v63, %v2133_v60  ;;  %v2136_v4 = vpop.f32.mrb[58].mxu1  ;;  %v2073_v8 = vpop.f32.mrb[59].mxu0  ;;  %v1876_v63 = vunpack.c.l.bf16 %v2959_v45 }
 0x16a   :  { %v1362_v9 = vadd.f32 %v2071_v43, %v2866_v51  ;;  %v2074_v35 = vadd.f32 %v2073_v8, %v2072_v1  ;;  %v2137_v10 = vpop.f32.mrb[59].mxu1  ;;  %v1860_v43 = vunpack.c.l.bf16 %v2954_v29  ;;  %v1865_v1 = vunpack.c.h.bf16 %v2939_v36 }
 0x16b   :  { %v2138_v11 = vadd.f32 %v2137_v10, %v2136_v4  ;;  %v1861_v10 = vunpack.c.h.bf16 %v2954_v29 }
 0x16c   :  { %v1365_v12 = vadd.f32 %v2074_v35, %v2868_v53  ;;  %v2910_v37 = vadd.f32 %v2135_v2, %v1362_v9  ;;  %v2922_v53 = vld [vmem:[%s3078_s3 + $0x28] sm:$0xff]   ;;  %v1881_v35 = vunpack.c.h.bf16 %v2944_v7 }
 0x16d   :  { %v1872_v27 = vunpack.c.l.bf16 %v2922_v53  ;;  %v1873_v48 = vunpack.c.h.bf16 %v2922_v53 }
 0x16e   :  { %v2075_v55 = vpop.f32.mrb[60].mxu0  ;;  %v2912_v13 = vadd.f32 %v2138_v11, %v1365_v12 }
 0x16f   :  { %v2139_v14 = vpop.f32.mrb[60].mxu1  ;;  %v2076_v15 = vpop.f32.mrb[61].mxu0 }
 0x170   :  { %v2077_v57 = vadd.f32 %v2076_v15, %v2075_v55  ;;  %v2140_v17 = vpop.f32.mrb[61].mxu1  ;;  %v2078_v20 = vpop.f32.mrb[62].mxu0  ;;  %v1877_v15 = vunpack.c.h.bf16 %v2959_v45 }
 0x171   :  { %v2141_v51 = vadd.f32 %v2140_v17, %v2139_v14  ;;  %v2142_v23 = vpop.f32.mrb[62].mxu1  ;;  %v2079_v25 = vpop.f32.mrb[63].mxu0 }
 0x172   :  { %v1370_v30 = vadd.f32 %v2077_v57, %v2870_v3  ;;  %v2080_v31 = vadd.f32 %v2079_v25, %v2078_v20  ;;  %v2143_v32 = vpop.f32.mrb[63].mxu1 }
 0x173   :  { %v2144_v33 = vadd.f32 %v2143_v32, %v2142_v23 }
 0x174   :  { %v1373_v3 = vadd.f32 %v2080_v31, %v2872_v6  ;;  %v2949_v42 = vadd.f32 %v2141_v51, %v1370_v30  ;;  %v1857_v6 = vunpack.c.h.bf16 %v2917_v22 }
 0x176   :  { %v2179_v19 = vpop.f32.mrb[64].mxu0  ;;  %v2973_v21 = vadd.f32 %v2144_v33, %v1373_v3 }
 0x177   :  { %v1516_v41 = vadd.f32 %v2179_v19, %v2882_v44  ;;  %v2187_v60 = vpop.f32.mrb[64].mxu1  ;;  %v1507_v61 = vpop.f32.mrb[65].mxu0 }
 0x178   :  { %v1548_v2 = vadd.f32 %v2187_v60, %v1451_v58  ;;  %v1508_v4 = vadd.f32 %v1507_v61, %v2876_v24  ;;  %v1539_v8 = vpop.f32.mrb[65].mxu1  ;;  %v2180_v9 = vpop.f32.mrb[66].mxu0 }
 0x179   :  { %v1572_v11 = vadd.f32 %v2968_v50, %v1516_v41  ;;  %v1540_v44 = vadd.f32 %v1539_v8, %v2900_v38  ;;  %v1519_v12 = vadd.f32 %v2180_v9, %v2884_v46  ;;  %v2188_v55 = vpop.f32.mrb[66].mxu1  ;;  %v1510_v14 = vpop.f32.mrb[67].mxu0 }
 0x17a   :  { %v1580_v58 = vadd.f32 %v2968_v50, %v1548_v2  ;;  %v1570_v24 = vadd.f32 %v2968_v50, %v1508_v4  ;;  %v1551_v57 = vadd.f32 %v2188_v55, %v2906_v59  ;;  %v1511_v17 = vadd.f32 %v1510_v14, %v2878_v26  ;;  %v1542_v20 = vpop.f32.mrb[67].mxu1 }
 0x17b   :  { %v1655_v22 = vadd.f32 %v1856_v34, %v1572_v11  ;;  %v1578_v51 = vadd.f32 %v2968_v50, %v1540_v44  ;;  %v1573_v38 = vadd.f32 %v2968_v50, %v1519_v12  ;;  %v1543_v46 = vadd.f32 %v1542_v20, %v2902_v39 }
 0x17c   :  { %v1663_v23 = vadd.f32 %v1872_v27, %v1580_v58  ;;  %v1653_v25 = vadd.f32 %v1852_v40, %v1570_v24  ;;  %v1581_v53 = vadd.f32 %v2968_v50, %v1551_v57  ;;  %v1571_v28 = vadd.f32 %v2968_v50, %v1511_v17 }
 0x17d   :  { %v1671_v30 = vmax.f32 %v1655_v22, 0.0  ;;  %v1661_v31 = vadd.f32 %v1868_v47, %v1578_v51  ;;  %v1656_v32 = vadd.f32 %v1857_v6, %v1573_v38  ;;  %v1579_v59 = vadd.f32 %v2968_v50, %v1543_v46 }
 0x17e   :  { %v1679_v26 = vmax.f32 %v1663_v23, 0.0  ;;  %v1669_v5 = vmax.f32 %v1653_v25, 0.0  ;;  %v1664_v33 = vadd.f32 %v1873_v48, %v1581_v53  ;;  %v1654_v34 = vadd.f32 %v1853_v49, %v1571_v28  ;;  %v2183_v3 = vpop.f32.mrb[68].mxu0 }
 0x17f   :  { %1687 = vst [vmem:[%s3080_s4 + $0x10] sm:$0xff] %v1671_v30  ;;  %v1677_v39 = vmax.f32 %v1661_v31, 0.0  ;;  %v1672_v27 = vmax.f32 %v1656_v32, 0.0  ;;  %v1662_v40 = vadd.f32 %v1869_v52, %v1579_v59  ;;  %v1532_v19 = vadd.f32 %v2183_v3, %v2894_v16  ;;  %v2191_v41 = vpop.f32.mrb[68].mxu1  ;;  %v1523_v60 = vpop.f32.mrb[69].mxu0 }
 0x180   :  { %1695 = vst [vmem:[%s3080_s4 + $0x50] sm:$0xff] %v1679_v26  ;;  %1685 = vst [vmem:[%s3080_s4] sm:$0xff] %v1669_v5  ;;  %v1680_v47 = vmax.f32 %v1664_v33, 0.0  ;;  %v1670_v6 = vmax.f32 %v1654_v34, 0.0  ;;  %v1564_v48 = vadd.f32 %v2191_v41, %v2949_v42  ;;  %v1524_v49 = vadd.f32 %v1523_v60, %v2888_v62  ;;  %v1555_v61 = vpop.f32.mrb[69].mxu1  ;;  %v2184_v52 = vpop.f32.mrb[70].mxu0 }
 0x181   :  { %1693 = vst [vmem:[%s3080_s4 + $0x40] sm:$0xff] %v1677_v39  ;;  %1688 = vst [vmem:[%s3080_s4 + $0x18] sm:$0xff] %v1672_v27  ;;  %v1678_v16 = vmax.f32 %v1662_v40, 0.0  ;;  %v1576_v2 = vadd.f32 %v2968_v50, %v1532_v19  ;;  %v1556_v4 = vadd.f32 %v1555_v61, %v2910_v37  ;;  %v1535_v8 = vadd.f32 %v2184_v52, %v2896_v18  ;;  %v2192_v42 = vpop.f32.mrb[70].mxu1  ;;  %v1526_v9 = vpop.f32.mrb[71].mxu0 }
 0x182   :  { %1696 = vst [vmem:[%s3080_s4 + $0x58] sm:$0xff] %v1680_v47  ;;  %1686 = vst [vmem:[%s3080_s4 + $0x8] sm:$0xff] %v1670_v6  ;;  %v1584_v62 = vadd.f32 %v2968_v50, %v1564_v48  ;;  %v1574_v11 = vadd.f32 %v2968_v50, %v1524_v49  ;;  %v1567_v44 = vadd.f32 %v2192_v42, %v2973_v21  ;;  %v1558_v12 = vpop.f32.mrb[71].mxu1 }
 0x183   :  { %v1527_v37 = vadd.f32 %v1526_v9, %v2890_v0  ;;  %1694 = vst [vmem:[%s3080_s4 + $0x48] sm:$0xff] %v1678_v16  ;;  %v1659_v18 = vadd.f32 %v1864_v54, %v1576_v2  ;;  %v1582_v55 = vadd.f32 %v2968_v50, %v1556_v4  ;;  %v1577_v14 = vadd.f32 %v2968_v50, %v1535_v8 }
 0x184   :  { %v1559_v58 = vadd.f32 %v1558_v12, %v2912_v13  ;;  %v1667_v24 = vadd.f32 %v1880_v56, %v1584_v62  ;;  %v1657_v0 = vadd.f32 %v1860_v43, %v1574_v11  ;;  %v1585_v21 = vadd.f32 %v2968_v50, %v1567_v44 }
 0x185   :  { %v1575_v57 = vadd.f32 %v2968_v50, %v1527_v37  ;;  %v1675_v17 = vmax.f32 %v1659_v18, 0.0  ;;  %v1665_v54 = vadd.f32 %v1876_v63, %v1582_v55  ;;  %v1660_v20 = vadd.f32 %v1865_v1, %v1577_v14 }
 0x186   :  { %v1583_v22 = vadd.f32 %v2968_v50, %v1559_v58  ;;  %v1683_v13 = vmax.f32 %v1667_v24, 0.0  ;;  %v1673_v51 = vmax.f32 %v1657_v0, 0.0  ;;  %v1668_v56 = vadd.f32 %v1881_v35, %v1585_v21 }
 0x187   :  { %v1658_v43 = vadd.f32 %v1861_v10, %v1575_v57  ;;  %1691 = vst [vmem:[%s3080_s4 + $0x30] sm:$0xff] %v1675_v17  ;;  %v1681_v38 = vmax.f32 %v1665_v54, 0.0  ;;  %v1676_v46 = vmax.f32 %v1660_v20, 0.0 }
 0x188   :  { %v1666_v36 = vadd.f32 %v1877_v15, %v1583_v22  ;;  %1699 = vst [vmem:[%s3080_s4 + $0x70] sm:$0xff] %v1683_v13  ;;  %1689 = vst [vmem:[%s3080_s4 + $0x20] sm:$0xff] %v1673_v51  ;;  %v1684_v7 = vmax.f32 %v1668_v56, 0.0 }
 0x189   :  { %v1674_v29 = vmax.f32 %v1658_v43, 0.0  ;;  %1697 = vst [vmem:[%s3080_s4 + $0x60] sm:$0xff] %v1681_v38  ;;  %1692 = vst [vmem:[%s3080_s4 + $0x38] sm:$0xff] %v1676_v46 }
 0x18a   :  { %v1682_v45 = vmax.f32 %v1666_v36, 0.0  ;;  %1700 = vst [vmem:[%s3080_s4 + $0x78] sm:$0xff] %v1684_v7 }
 0x18b   :  { %1690 = vst [vmem:[%s3080_s4 + $0x28] sm:$0xff] %v1674_v29 }
 0x18c   :  { %1698 = vst [vmem:[%s3080_s4 + $0x68] sm:$0xff] %v1682_v45 }

</bundles_post_ra>
